<compile_context>
chip_gen: v5e
topology: v5e:2x2
jax: 0.10.0
libtpu: 0.0.40
codegen_flags: <defaults>
</compile_context>

<pallas_src>
import jax
import jax.numpy as jnp
import numpy as np
from jax.experimental import pallas as pl
from jax.experimental.pallas import tpu as pltpu


# ----------------------------------------------------------------------------
# Fused kernel: per batch element, all GCN layers with (adj+I) resident in VMEM.
# ----------------------------------------------------------------------------
def _make_gcn_fused_kernel(num_layers):
    def kernel(adj_ref, x_ref, invd_ref, *refs):
        w_refs = refs[:num_layers]
        b_refs = refs[num_layers:2 * num_layers]
        out_ref = refs[2 * num_layers]
        acc_f32 = refs[2 * num_layers + 1]      # (S_pad, d_pad) f32 scratch
        act_lo = refs[2 * num_layers + 2]       # (S_pad, d_pad) bf16 scratch

        adj_i = adj_ref[0]                      # (S_pad, S_pad) bf16, == adj + I
        inv_denom = invd_ref[0]                 # (S_pad, 1) f32, == 1/(rowsum+1)

        h = x_ref[0]                            # (S_pad, in_pad) bf16
        for l in range(num_layers):
            w = w_refs[l][...]                  # (din_pad, d_pad) bf16
            b2 = b_refs[l][...]                 # (1, d_pad) f32, == 2 * bias

            # xw = h @ W   (f32 accumulation on the MXU)
            acc_f32[...] = jnp.dot(h, w, preferred_element_type=jnp.float32)
            act_lo[...] = acc_f32[...].astype(act_lo.dtype)

            # pre = (adj + I) @ xw   (the residual is folded into adj+I)
            acc_f32[...] = jnp.dot(adj_i, act_lo[...],
                                   preferred_element_type=jnp.float32)

            y = jnp.maximum((acc_f32[...] + b2) * inv_denom, 0.0)

            if l < num_layers - 1:
                act_lo[...] = y.astype(act_lo.dtype)
                h = act_lo[...]
            else:
                out_ref[0] = y.astype(out_ref.dtype)

    return kernel


def _round_up(n, m):
    return ((n + m - 1) // m) * m


# ----------------------------------------------------------------------------
# Wrapper
# ----------------------------------------------------------------------------
def gcn_forward(params, token_encode, adj, batch=True,
                compute_dtype=jnp.bfloat16, out_dtype=None, trim_output=True):
    """Matches GCN.forward (eval mode). If batch=False, inputs are unbatched
    and get a leading batch dim of 1 (like adj.unsqueeze(0) in torch)."""
    if not batch:
        adj = adj[None]
        token_encode = token_encode[None]
    if out_dtype is None:
        out_dtype = compute_dtype

    B, S, in_dim = token_encode.shape
    mem_dim = params[0][0].shape[1]
    num_layers = len(params)

    s_pad = _round_up(S, 128)
    in_pad = _round_up(in_dim, 128)
    d_pad = _round_up(mem_dim, 128)

    # --- degree sums / denom / mask in the wrapper (XLA fuses them with the
    # --- adj+I construction pass below; removes the N=1 MXU matmuls).
    rowsum = jnp.sum(adj, axis=2)                         # (B, S)
    colsum = jnp.sum(adj, axis=1)                         # (B, S)
    mask = ((rowsum + colsum) == 0.0)[..., None]          # (B, S, 1) bool
    inv_denom = (1.0 / (rowsum + 1.0)).astype(jnp.float32)[..., None]
    invd_p = jnp.pad(inv_denom, ((0, 0), (0, s_pad - S), (0, 0)))

    # --- adj + I, cast to bf16 (exact for 0/1 adjacency), zero-pad to S_pad.
    # TODO(synk): weighted (non-0/1) adjacencies lose precision in bf16.
    eye = jnp.eye(S, dtype=adj.dtype)
    adj_i = (adj + eye[None]).astype(compute_dtype)
    adj_i_p = jnp.pad(adj_i, ((0, 0), (0, s_pad - S), (0, s_pad - S)))

    # --- activations, lane-dense padded.
    x_p = jnp.pad(token_encode.astype(compute_dtype),
                  ((0, 0), (0, s_pad - S), (0, in_pad - in_dim)))

    # --- weights padded to lane-dense dims; bias folded to 2*b (residual fold).
    w_list, b_list = [], []
    for l, (w_t, b) in enumerate(params):
        din = w_t.shape[0]
        din_pad = in_pad if l == 0 else d_pad
        w_p = jnp.zeros((din_pad, d_pad), jnp.float32).at[:din, :mem_dim].set(w_t)
        b_p = jnp.zeros((1, d_pad), jnp.float32).at[0, :mem_dim].set(2.0 * b)
        w_list.append(w_p.astype(compute_dtype))
        b_list.append(b_p)

    # --- VMEM budget.
    csz = jnp.dtype(compute_dtype).itemsize
    osz = jnp.dtype(out_dtype).itemsize
    wbytes = sum(int(np.prod(w.shape)) * csz for w in w_list)
    bbytes = sum(int(np.prod(bb.shape)) * 4 for bb in b_list)
    need = (2 * s_pad * s_pad * csz          # adj+I (double-buffered)
            + 2 * s_pad * in_pad * csz       # x
            + 2 * s_pad * 4                  # inv_denom
            + 2 * s_pad * d_pad * osz        # output slab
            + wbytes + bbytes                # resident weights/biases
            + s_pad * d_pad * (4 + csz))     # scratch accumulators
    vmem_limit = int(min(max(2 * need, 16 * 2 ** 20), 100 * 2 ** 20))

    out_shape = jax.ShapeDtypeStruct((B, s_pad, d_pad), out_dtype)
    out_spec = pl.BlockSpec((1, s_pad, d_pad), lambda b: (b, 0, 0))
    scratch = [pltpu.VMEM((s_pad, d_pad), jnp.float32),
               pltpu.VMEM((s_pad, d_pad), compute_dtype)]

    def _build_call(single_buffer_weights):
        if single_buffer_weights and hasattr(pl, "Buffered"):
            def const_spec(shape):
                return pl.BlockSpec(shape, lambda b: (0, 0),
                                    pipeline_mode=pl.Buffered(1))
        else:
            def const_spec(shape):
                return pl.BlockSpec(shape, lambda b: (0, 0))

        in_specs = (
            [pl.BlockSpec((1, s_pad, s_pad), lambda b: (b, 0, 0)),
             pl.BlockSpec((1, s_pad, in_pad), lambda b: (b, 0, 0)),
             pl.BlockSpec((1, s_pad, 1), lambda b: (b, 0, 0))]
            + [const_spec(w.shape) for w in w_list]
            + [const_spec(bb.shape) for bb in b_list]
        )
        return pl.pallas_call(
            _make_gcn_fused_kernel(num_layers),
            out_shape=out_shape,
            grid_spec=pltpu.PrefetchScalarGridSpec(
                num_scalar_prefetch=0,
                grid=(B,),
                in_specs=in_specs,
                out_specs=out_spec,
                scratch_shapes=scratch),
            compiler_params=pltpu.CompilerParams(
                dimension_semantics=("parallel",),
                vmem_limit_bytes=vmem_limit),
        )

    args = (adj_i_p, x_p, invd_p, *w_list, *b_list)
    try:
        out_p = _build_call(True)(*args)
    except Exception:
        # Older jax without BlockSpec.pipeline_mode support: double-buffer weights.
        out_p = _build_call(False)(*args)

    if trim_output:
        # NOTE: keeping the padded (B, s_pad, d_pad) slab through the consumer
        # avoids an extra HBM round trip for the slice; set trim_output=False.
        out = out_p[:, :S, :mem_dim]
    else:
        out = out_p
    return out, mask


# ----------------------------------------------------------------------------
# Parameter init (nn.Linear-style), storing W^T so kernels do x @ W^T.
# ----------------------------------------------------------------------------
def init_gcn_params(key, in_dim, mem_dim, num_layers):
    params = []
    for layer in range(num_layers):
        input_dim = in_dim if layer == 0 else mem_dim
        key, kw, kb = jax.random.split(key, 3)
        bound = 1.0 / np.sqrt(input_dim)
        w_t = jax.random.uniform(kw, (input_dim, mem_dim), jnp.float32,
                                 minval=-bound, maxval=bound)
        b = jax.random.uniform(kb, (mem_dim,), jnp.float32,
                               minval=-bound, maxval=bound)
        params.append((w_t, b))
    return params


# ----------------------------------------------------------------------------
# Pure-JAX f32 reference for validation
# ----------------------------------------------------------------------------
def gcn_forward_ref(params, token_encode, adj):
    denom = jnp.sum(adj, axis=2, keepdims=True) + 1.0
    mask = ((jnp.sum(adj, axis=2) + jnp.sum(adj, axis=1)) == 0)[..., None]
    x = token_encode
    for (w_t, b) in params:
        ax = jnp.einsum('bij,bjd->bid', adj, x)
        axw = (ax @ w_t + b) + (x @ w_t + b)
        x = jax.nn.relu(axw / denom)
    return x, mask


if __name__ == "__main__":
    B, S = 2, 16
    in_dim, mem_dim, num_layers = 16, 32, 2

    key = jax.random.PRNGKey(0)
    k_tok, k_adj, k_par = jax.random.split(key, 3)

    token_encode = jax.random.normal(k_tok, (B, S, in_dim), jnp.float32)
    adj = (jax.random.uniform(k_adj, (B, S, S)) < 0.3).astype(jnp.float32)
    # Make one node fully isolated so mask has a True entry.
    adj = adj.at[0, 0, :].set(0.0).at[0, :, 0].set(0.0)

    params = init_gcn_params(k_par, in_dim, mem_dim, num_layers)

    out, mask = gcn_forward(params, token_encode, adj, batch=True)
    out = jax.block_until_ready(out)
    mask = jax.block_until_ready(mask)

    out_ref, mask_ref = gcn_forward_ref(params, token_encode, adj)
    # bf16 MXU inputs / bf16 output with f32 accumulation -> compare against the
    # f32 reference with a bf16-appropriate tolerance; mask is exact.
    np.testing.assert_allclose(np.asarray(out.astype(jnp.float32)),
                               np.asarray(out_ref), rtol=2e-2, atol=3e-2)
    np.testing.assert_array_equal(np.asarray(mask), np.asarray(mask_ref))

    print("KERNEL_OK")
</pallas_src>

<mosaic_0001>
module attributes {stable_mosaic.version = 11 : i64} {
  func.func @kernel(%arg0: i32, %arg1: memref<1x128x128xbf16, #tpu.memory_space<vmem>>, %arg2: memref<1x128x128xbf16, #tpu.memory_space<vmem>>, %arg3: memref<1x128x1xf32, #tpu.memory_space<vmem>>, %arg4: memref<128x128xbf16, #tpu.memory_space<vmem>>, %arg5: memref<128x128xbf16, #tpu.memory_space<vmem>>, %arg6: memref<1x128xf32, #tpu.memory_space<vmem>>, %arg7: memref<1x128xf32, #tpu.memory_space<vmem>>, %arg8: memref<1x128x128xbf16, #tpu.memory_space<vmem>>, %arg9: memref<128x128xf32, #tpu.memory_space<vmem>>, %arg10: memref<128x128xbf16, #tpu.memory_space<vmem>>) attributes {dimension_semantics = [#tpu.dimension_semantics<parallel>], iteration_bounds = array<i64: 2>, scalar_prefetch = 0 : i64, scratch_operands = 2 : i64, tpu.core_type = #tpu.core_type<tc>, window_params = [{transform_indices = @transform_0, window_bounds = array<i64: 1, 128, 128>}, {transform_indices = @transform_1, window_bounds = array<i64: 1, 128, 128>}, {transform_indices = @transform_2, window_bounds = array<i64: 1, 128, 1>}, {pipeline_mode = #tpu.pipeline_mode<synchronous>, transform_indices = @transform_3, window_bounds = array<i64: 128, 128>}, {pipeline_mode = #tpu.pipeline_mode<synchronous>, transform_indices = @transform_4, window_bounds = array<i64: 128, 128>}, {pipeline_mode = #tpu.pipeline_mode<synchronous>, transform_indices = @transform_5, window_bounds = array<i64: 1, 128>}, {pipeline_mode = #tpu.pipeline_mode<synchronous>, transform_indices = @transform_6, window_bounds = array<i64: 1, 128>}, {transform_indices = @transform_7, window_bounds = array<i64: 1, 128, 128>}]} {
    %c0 = arith.constant 0 : index
    %c0_0 = arith.constant 0 : index
    %c0_1 = arith.constant 0 : index
    %0 = vector.load %arg1[%c0, %c0_0, %c0_1] : memref<1x128x128xbf16, #tpu.memory_space<vmem>>, vector<1x128x128xbf16>
    %1 = vector.shape_cast %0 : vector<1x128x128xbf16> to vector<128x128xbf16>
    %c0_2 = arith.constant 0 : index
    %c0_3 = arith.constant 0 : index
    %c0_4 = arith.constant 0 : index
    %2 = vector.load %arg3[%c0_2, %c0_3, %c0_4] : memref<1x128x1xf32, #tpu.memory_space<vmem>>, vector<1x128x1xf32>
    %3 = vector.shape_cast %2 : vector<1x128x1xf32> to vector<128x1xf32>
    %c0_5 = arith.constant 0 : index
    %c0_6 = arith.constant 0 : index
    %c0_7 = arith.constant 0 : index
    %4 = vector.load %arg2[%c0_5, %c0_6, %c0_7] : memref<1x128x128xbf16, #tpu.memory_space<vmem>>, vector<1x128x128xbf16>
    %5 = vector.shape_cast %4 : vector<1x128x128xbf16> to vector<128x128xbf16>
    %c0_8 = arith.constant 0 : index
    %c0_9 = arith.constant 0 : index
    %6 = vector.load %arg4[%c0_8, %c0_9] : memref<128x128xbf16, #tpu.memory_space<vmem>>, vector<128x128xbf16>
    %c0_10 = arith.constant 0 : index
    %c0_11 = arith.constant 0 : index
    %7 = vector.load %arg6[%c0_10, %c0_11] : memref<1x128xf32, #tpu.memory_space<vmem>>, vector<1x128xf32>
    %cst = arith.constant dense<0.000000e+00> : vector<128x128xf32>
    %8 = tpu.matmul %5, %6, %cst {dimension_numbers = #tpu.dot_dimension_numbers<[1], [0], [0], [1], [0, 0, 1, 1], [], []>} : vector<128x128xbf16>, vector<128x128xbf16>, vector<128x128xf32> -> vector<128x128xf32>
    %c0_12 = arith.constant 0 : index
    %c0_13 = arith.constant 0 : index
    %9 = vector.load %arg9[%c0_12, %c0_13] : memref<128x128xf32, #tpu.memory_space<vmem>>, vector<128x128xf32>
    tpu.vector_store %arg9[%c0_12, %c0_13], %8 {strides = array<i32>} : memref<128x128xf32, #tpu.memory_space<vmem>>, vector<128x128xf32>,
    %c0_14 = arith.constant 0 : index
    %c0_15 = arith.constant 0 : index
    %10 = vector.load %arg9[%c0_14, %c0_15] : memref<128x128xf32, #tpu.memory_space<vmem>>, vector<128x128xf32>
    %11 = arith.truncf %10 : vector<128x128xf32> to vector<128x128xbf16>
    %c0_16 = arith.constant 0 : index
    %c0_17 = arith.constant 0 : index
    %12 = vector.load %arg10[%c0_16, %c0_17] : memref<128x128xbf16, #tpu.memory_space<vmem>>, vector<128x128xbf16>
    tpu.vector_store %arg10[%c0_16, %c0_17], %11 {strides = array<i32>} : memref<128x128xbf16, #tpu.memory_space<vmem>>, vector<128x128xbf16>,
    %c0_18 = arith.constant 0 : index
    %c0_19 = arith.constant 0 : index
    %13 = vector.load %arg10[%c0_18, %c0_19] : memref<128x128xbf16, #tpu.memory_space<vmem>>, vector<128x128xbf16>
    %cst_20 = arith.constant dense<0.000000e+00> : vector<128x128xf32>
    %14 = tpu.matmul %1, %13, %cst_20 {dimension_numbers = #tpu.dot_dimension_numbers<[1], [0], [0], [1], [0, 0, 1, 1], [], []>} : vector<128x128xbf16>, vector<128x128xbf16>, vector<128x128xf32> -> vector<128x128xf32>
    %c0_21 = arith.constant 0 : index
    %c0_22 = arith.constant 0 : index
    %15 = vector.load %arg9[%c0_21, %c0_22] : memref<128x128xf32, #tpu.memory_space<vmem>>, vector<128x128xf32>
    tpu.vector_store %arg9[%c0_21, %c0_22], %14 {strides = array<i32>} : memref<128x128xf32, #tpu.memory_space<vmem>>, vector<128x128xf32>,
    %c0_23 = arith.constant 0 : index
    %c0_24 = arith.constant 0 : index
    %16 = vector.load %arg9[%c0_23, %c0_24] : memref<128x128xf32, #tpu.memory_space<vmem>>, vector<128x128xf32>
    %17 = vector.broadcast %7 : vector<1x128xf32> to vector<128x128xf32>
    %18 = arith.addf %16, %17 : vector<128x128xf32>
    %19 = vector.broadcast %3 : vector<128x1xf32> to vector<128x128xf32>
    %20 = arith.mulf %18, %19 : vector<128x128xf32>
    %cst_25 = arith.constant 0.000000e+00 : f32
    %21 = vector.broadcast %cst_25 : f32 to vector<128x128xf32>
    %22 = arith.maximumf %20, %21 : vector<128x128xf32>
    %23 = arith.truncf %22 : vector<128x128xf32> to vector<128x128xbf16>
    %c0_26 = arith.constant 0 : index
    %c0_27 = arith.constant 0 : index
    %24 = vector.load %arg10[%c0_26, %c0_27] : memref<128x128xbf16, #tpu.memory_space<vmem>>, vector<128x128xbf16>
    tpu.vector_store %arg10[%c0_26, %c0_27], %23 {strides = array<i32>} : memref<128x128xbf16, #tpu.memory_space<vmem>>, vector<128x128xbf16>,
    %c0_28 = arith.constant 0 : index
    %c0_29 = arith.constant 0 : index
    %25 = vector.load %arg10[%c0_28, %c0_29] : memref<128x128xbf16, #tpu.memory_space<vmem>>, vector<128x128xbf16>
    %c0_30 = arith.constant 0 : index
    %c0_31 = arith.constant 0 : index
    %26 = vector.load %arg5[%c0_30, %c0_31] : memref<128x128xbf16, #tpu.memory_space<vmem>>, vector<128x128xbf16>
    %c0_32 = arith.constant 0 : index
    %c0_33 = arith.constant 0 : index
    %27 = vector.load %arg7[%c0_32, %c0_33] : memref<1x128xf32, #tpu.memory_space<vmem>>, vector<1x128xf32>
    %cst_34 = arith.constant dense<0.000000e+00> : vector<128x128xf32>
    %28 = tpu.matmul %25, %26, %cst_34 {dimension_numbers = #tpu.dot_dimension_numbers<[1], [0], [0], [1], [0, 0, 1, 1], [], []>} : vector<128x128xbf16>, vector<128x128xbf16>, vector<128x128xf32> -> vector<128x128xf32>
    %c0_35 = arith.constant 0 : index
    %c0_36 = arith.constant 0 : index
    %29 = vector.load %arg9[%c0_35, %c0_36] : memref<128x128xf32, #tpu.memory_space<vmem>>, vector<128x128xf32>
    tpu.vector_store %arg9[%c0_35, %c0_36], %28 {strides = array<i32>} : memref<128x128xf32, #tpu.memory_space<vmem>>, vector<128x128xf32>,
    %c0_37 = arith.constant 0 : index
    %c0_38 = arith.constant 0 : index
    %30 = vector.load %arg9[%c0_37, %c0_38] : memref<128x128xf32, #tpu.memory_space<vmem>>, vector<128x128xf32>
    %31 = arith.truncf %30 : vector<128x128xf32> to vector<128x128xbf16>
    %c0_39 = arith.constant 0 : index
    %c0_40 = arith.constant 0 : index
    %32 = vector.load %arg10[%c0_39, %c0_40] : memref<128x128xbf16, #tpu.memory_space<vmem>>, vector<128x128xbf16>
    tpu.vector_store %arg10[%c0_39, %c0_40], %31 {strides = array<i32>} : memref<128x128xbf16, #tpu.memory_space<vmem>>, vector<128x128xbf16>,
    %c0_41 = arith.constant 0 : index
    %c0_42 = arith.constant 0 : index
    %33 = vector.load %arg10[%c0_41, %c0_42] : memref<128x128xbf16, #tpu.memory_space<vmem>>, vector<128x128xbf16>
    %cst_43 = arith.constant dense<0.000000e+00> : vector<128x128xf32>
    %34 = tpu.matmul %1, %33, %cst_43 {dimension_numbers = #tpu.dot_dimension_numbers<[1], [0], [0], [1], [0, 0, 1, 1], [], []>} : vector<128x128xbf16>, vector<128x128xbf16>, vector<128x128xf32> -> vector<128x128xf32>
    %c0_44 = arith.constant 0 : index
    %c0_45 = arith.constant 0 : index
    %35 = vector.load %arg9[%c0_44, %c0_45] : memref<128x128xf32, #tpu.memory_space<vmem>>, vector<128x128xf32>
    tpu.vector_store %arg9[%c0_44, %c0_45], %34 {strides = array<i32>} : memref<128x128xf32, #tpu.memory_space<vmem>>, vector<128x128xf32>,
    %c0_46 = arith.constant 0 : index
    %c0_47 = arith.constant 0 : index
    %36 = vector.load %arg9[%c0_46, %c0_47] : memref<128x128xf32, #tpu.memory_space<vmem>>, vector<128x128xf32>
    %37 = vector.broadcast %27 : vector<1x128xf32> to vector<128x128xf32>
    %38 = arith.addf %36, %37 : vector<128x128xf32>
    %39 = vector.broadcast %3 : vector<128x1xf32> to vector<128x128xf32>
    %40 = arith.mulf %38, %39 : vector<128x128xf32>
    %cst_48 = arith.constant 0.000000e+00 : f32
    %41 = vector.broadcast %cst_48 : f32 to vector<128x128xf32>
    %42 = arith.maximumf %40, %41 : vector<128x128xf32>
    %43 = arith.truncf %42 : vector<128x128xf32> to vector<128x128xbf16>
    %c0_49 = arith.constant 0 : index
    %c0_50 = arith.constant 0 : index
    %c0_51 = arith.constant 0 : index
    %44 = vector.load %arg8[%c0_49, %c0_50, %c0_51] : memref<1x128x128xbf16, #tpu.memory_space<vmem>>, vector<1x128x128xbf16>
    %45 = vector.shape_cast %44 : vector<1x128x128xbf16> to vector<128x128xbf16>
    %46 = vector.shape_cast %43 : vector<128x128xbf16> to vector<1x128x128xbf16>
    tpu.vector_store %arg8[%c0_49, %c0_50, %c0_51], %46 {strides = array<i32>} : memref<1x128x128xbf16, #tpu.memory_space<vmem>>, vector<1x128x128xbf16>,
    return
  }
  func.func @transform_0(%arg0: i32) -> (i32, i32, i32) {
    %c0_i32 = arith.constant 0 : i32
    %c0_i32_0 = arith.constant 0 : i32
    %c0_i32_1 = arith.constant 0 : i32
    return %arg0, %c0_i32, %c0_i32_0 : i32, i32, i32
  }
  func.func @transform_1(%arg0: i32) -> (i32, i32, i32) {
    %c0_i32 = arith.constant 0 : i32
    %c0_i32_0 = arith.constant 0 : i32
    %c0_i32_1 = arith.constant 0 : i32
    return %arg0, %c0_i32, %c0_i32_0 : i32, i32, i32
  }
  func.func @transform_2(%arg0: i32) -> (i32, i32, i32) {
    %c0_i32 = arith.constant 0 : i32
    %c0_i32_0 = arith.constant 0 : i32
    %c0_i32_1 = arith.constant 0 : i32
    return %arg0, %c0_i32, %c0_i32_0 : i32, i32, i32
  }
  func.func @transform_3(%arg0: i32) -> (i32, i32) {
    %c0_i32 = arith.constant 0 : i32
    %c0_i32_0 = arith.constant 0 : i32
    %c0_i32_1 = arith.constant 0 : i32
    return %c0_i32, %c0_i32_0 : i32, i32
  }
  func.func @transform_4(%arg0: i32) -> (i32, i32) {
    %c0_i32 = arith.constant 0 : i32
    %c0_i32_0 = arith.constant 0 : i32
    %c0_i32_1 = arith.constant 0 : i32
    return %c0_i32, %c0_i32_0 : i32, i32
  }
  func.func @transform_5(%arg0: i32) -> (i32, i32) {
    %c0_i32 = arith.constant 0 : i32
    %c0_i32_0 = arith.constant 0 : i32
    %c0_i32_1 = arith.constant 0 : i32
    return %c0_i32, %c0_i32_0 : i32, i32
  }
  func.func @transform_6(%arg0: i32) -> (i32, i32) {
    %c0_i32 = arith.constant 0 : i32
    %c0_i32_0 = arith.constant 0 : i32
    %c0_i32_1 = arith.constant 0 : i32
    return %c0_i32, %c0_i32_0 : i32, i32
  }
  func.func @transform_7(%arg0: i32) -> (i32, i32, i32) {
    %c0_i32 = arith.constant 0 : i32
    %c0_i32_0 = arith.constant 0 : i32
    %c0_i32_1 = arith.constant 0 : i32
    return %arg0, %c0_i32, %c0_i32_0 : i32, i32, i32
  }
}

module attributes {stable_mosaic.version = 11 : i64} {
  func.func @kernel(%arg0: i32, %arg1: memref<1x128x128xbf16, #tpu.memory_space<vmem>>, %arg2: memref<1x128x128xbf16, #tpu.memory_space<vmem>>, %arg3: memref<1x128x1xf32, #tpu.memory_space<vmem>>, %arg4: memref<128x128xbf16, #tpu.memory_space<vmem>>, %arg5: memref<128x128xbf16, #tpu.memory_space<vmem>>, %arg6: memref<1x128xf32, #tpu.memory_space<vmem>>, %arg7: memref<1x128xf32, #tpu.memory_space<vmem>>, %arg8: memref<1x128x128xbf16, #tpu.memory_space<vmem>>, %arg9: memref<128x128xf32, #tpu.memory_space<vmem>>, %arg10: memref<128x128xbf16, #tpu.memory_space<vmem>>) attributes {dimension_semantics = [#tpu.dimension_semantics<parallel>], iteration_bounds = array<i64: 2>, scalar_prefetch = 0 : i64, scratch_operands = 2 : i64, tpu.core_type = #tpu.core_type<tc>, window_params = [{transform_indices = @transform_0, window_bounds = array<i64: 1, 128, 128>}, {transform_indices = @transform_1, window_bounds = array<i64: 1, 128, 128>}, {transform_indices = @transform_2, window_bounds = array<i64: 1, 128, 1>}, {pipeline_mode = #tpu.pipeline_mode<synchronous>, transform_indices = @transform_3, window_bounds = array<i64: 128, 128>}, {pipeline_mode = #tpu.pipeline_mode<synchronous>, transform_indices = @transform_4, window_bounds = array<i64: 128, 128>}, {pipeline_mode = #tpu.pipeline_mode<synchronous>, transform_indices = @transform_5, window_bounds = array<i64: 1, 128>}, {pipeline_mode = #tpu.pipeline_mode<synchronous>, transform_indices = @transform_6, window_bounds = array<i64: 1, 128>}, {transform_indices = @transform_7, window_bounds = array<i64: 1, 128, 128>}]} {
    %c0 = arith.constant 0 : index
    %c0_0 = arith.constant 0 : index
    %c0_1 = arith.constant 0 : index
    %0 = vector.load %arg1[%c0, %c0_0, %c0_1] : memref<1x128x128xbf16, #tpu.memory_space<vmem>>, vector<1x128x128xbf16>
    %1 = vector.shape_cast %0 : vector<1x128x128xbf16> to vector<128x128xbf16>
    %c0_2 = arith.constant 0 : index
    %c0_3 = arith.constant 0 : index
    %c0_4 = arith.constant 0 : index
    %2 = vector.load %arg3[%c0_2, %c0_3, %c0_4] : memref<1x128x1xf32, #tpu.memory_space<vmem>>, vector<1x128x1xf32>
    %3 = vector.shape_cast %2 : vector<1x128x1xf32> to vector<128x1xf32>
    %c0_5 = arith.constant 0 : index
    %c0_6 = arith.constant 0 : index
    %c0_7 = arith.constant 0 : index
    %4 = vector.load %arg2[%c0_5, %c0_6, %c0_7] : memref<1x128x128xbf16, #tpu.memory_space<vmem>>, vector<1x128x128xbf16>
    %5 = vector.shape_cast %4 : vector<1x128x128xbf16> to vector<128x128xbf16>
    %c0_8 = arith.constant 0 : index
    %c0_9 = arith.constant 0 : index
    %6 = vector.load %arg4[%c0_8, %c0_9] : memref<128x128xbf16, #tpu.memory_space<vmem>>, vector<128x128xbf16>
    %c0_10 = arith.constant 0 : index
    %c0_11 = arith.constant 0 : index
    %7 = vector.load %arg6[%c0_10, %c0_11] : memref<1x128xf32, #tpu.memory_space<vmem>>, vector<1x128xf32>
    %cst = arith.constant dense<0.000000e+00> : vector<128x128xf32>
    %8 = tpu.matmul %5, %6, %cst {dimension_numbers = #tpu.dot_dimension_numbers<[1], [0], [0], [1], [0, 0, 1, 1], [], []>} : vector<128x128xbf16>, vector<128x128xbf16>, vector<128x128xf32> -> vector<128x128xf32>
    %c0_12 = arith.constant 0 : index
    %c0_13 = arith.constant 0 : index
    %9 = vector.load %arg9[%c0_12, %c0_13] : memref<128x128xf32, #tpu.memory_space<vmem>>, vector<128x128xf32>
    tpu.vector_store %arg9[%c0_12, %c0_13], %8 {strides = array<i32>} : memref<128x128xf32, #tpu.memory_space<vmem>>, vector<128x128xf32>,
    %c0_14 = arith.constant 0 : index
    %c0_15 = arith.constant 0 : index
    %10 = vector.load %arg9[%c0_14, %c0_15] : memref<128x128xf32, #tpu.memory_space<vmem>>, vector<128x128xf32>
    %11 = arith.truncf %10 : vector<128x128xf32> to vector<128x128xbf16>
    %c0_16 = arith.constant 0 : index
    %c0_17 = arith.constant 0 : index
    %12 = vector.load %arg10[%c0_16, %c0_17] : memref<128x128xbf16, #tpu.memory_space<vmem>>, vector<128x128xbf16>
    tpu.vector_store %arg10[%c0_16, %c0_17], %11 {strides = array<i32>} : memref<128x128xbf16, #tpu.memory_space<vmem>>, vector<128x128xbf16>,
    %c0_18 = arith.constant 0 : index
    %c0_19 = arith.constant 0 : index
    %13 = vector.load %arg10[%c0_18, %c0_19] : memref<128x128xbf16, #tpu.memory_space<vmem>>, vector<128x128xbf16>
    %cst_20 = arith.constant dense<0.000000e+00> : vector<128x128xf32>
    %14 = tpu.matmul %1, %13, %cst_20 {dimension_numbers = #tpu.dot_dimension_numbers<[1], [0], [0], [1], [0, 0, 1, 1], [], []>} : vector<128x128xbf16>, vector<128x128xbf16>, vector<128x128xf32> -> vector<128x128xf32>
    %c0_21 = arith.constant 0 : index
    %c0_22 = arith.constant 0 : index
    %15 = vector.load %arg9[%c0_21, %c0_22] : memref<128x128xf32, #tpu.memory_space<vmem>>, vector<128x128xf32>
    tpu.vector_store %arg9[%c0_21, %c0_22], %14 {strides = array<i32>} : memref<128x128xf32, #tpu.memory_space<vmem>>, vector<128x128xf32>,
    %c0_23 = arith.constant 0 : index
    %c0_24 = arith.constant 0 : index
    %16 = vector.load %arg9[%c0_23, %c0_24] : memref<128x128xf32, #tpu.memory_space<vmem>>, vector<128x128xf32>
    %17 = vector.broadcast %7 : vector<1x128xf32> to vector<128x128xf32>
    %18 = arith.addf %16, %17 : vector<128x128xf32>
    %19 = vector.broadcast %3 : vector<128x1xf32> to vector<128x128xf32>
    %20 = arith.mulf %18, %19 : vector<128x128xf32>
    %cst_25 = arith.constant 0.000000e+00 : f32
    %21 = vector.broadcast %cst_25 : f32 to vector<128x128xf32>
    %22 = arith.maximumf %20, %21 : vector<128x128xf32>
    %23 = arith.truncf %22 : vector<128x128xf32> to vector<128x128xbf16>
    %c0_26 = arith.constant 0 : index
    %c0_27 = arith.constant 0 : index
    %24 = vector.load %arg10[%c0_26, %c0_27] : memref<128x128xbf16, #tpu.memory_space<vmem>>, vector<128x128xbf16>
    tpu.vector_store %arg10[%c0_26, %c0_27], %23 {strides = array<i32>} : memref<128x128xbf16, #tpu.memory_space<vmem>>, vector<128x128xbf16>,
    %c0_28 = arith.constant 0 : index
    %c0_29 = arith.constant 0 : index
    %25 = vector.load %arg10[%c0_28, %c0_29] : memref<128x128xbf16, #tpu.memory_space<vmem>>, vector<128x128xbf16>
    %c0_30 = arith.constant 0 : index
    %c0_31 = arith.constant 0 : index
    %26 = vector.load %arg5[%c0_30, %c0_31] : memref<128x128xbf16, #tpu.memory_space<vmem>>, vector<128x128xbf16>
    %c0_32 = arith.constant 0 : index
    %c0_33 = arith.constant 0 : index
    %27 = vector.load %arg7[%c0_32, %c0_33] : memref<1x128xf32, #tpu.memory_space<vmem>>, vector<1x128xf32>
    %cst_34 = arith.constant dense<0.000000e+00> : vector<128x128xf32>
    %28 = tpu.matmul %25, %26, %cst_34 {dimension_numbers = #tpu.dot_dimension_numbers<[1], [0], [0], [1], [0, 0, 1, 1], [], []>} : vector<128x128xbf16>, vector<128x128xbf16>, vector<128x128xf32> -> vector<128x128xf32>
    %c0_35 = arith.constant 0 : index
    %c0_36 = arith.constant 0 : index
    %29 = vector.load %arg9[%c0_35, %c0_36] : memref<128x128xf32, #tpu.memory_space<vmem>>, vector<128x128xf32>
    tpu.vector_store %arg9[%c0_35, %c0_36], %28 {strides = array<i32>} : memref<128x128xf32, #tpu.memory_space<vmem>>, vector<128x128xf32>,
    %c0_37 = arith.constant 0 : index
    %c0_38 = arith.constant 0 : index
    %30 = vector.load %arg9[%c0_37, %c0_38] : memref<128x128xf32, #tpu.memory_space<vmem>>, vector<128x128xf32>
    %31 = arith.truncf %30 : vector<128x128xf32> to vector<128x128xbf16>
    %c0_39 = arith.constant 0 : index
    %c0_40 = arith.constant 0 : index
    %32 = vector.load %arg10[%c0_39, %c0_40] : memref<128x128xbf16, #tpu.memory_space<vmem>>, vector<128x128xbf16>
    tpu.vector_store %arg10[%c0_39, %c0_40], %31 {strides = array<i32>} : memref<128x128xbf16, #tpu.memory_space<vmem>>, vector<128x128xbf16>,
    %c0_41 = arith.constant 0 : index
    %c0_42 = arith.constant 0 : index
    %33 = vector.load %arg10[%c0_41, %c0_42] : memref<128x128xbf16, #tpu.memory_space<vmem>>, vector<128x128xbf16>
    %cst_43 = arith.constant dense<0.000000e+00> : vector<128x128xf32>
    %34 = tpu.matmul %1, %33, %cst_43 {dimension_numbers = #tpu.dot_dimension_numbers<[1], [0], [0], [1], [0, 0, 1, 1], [], []>} : vector<128x128xbf16>, vector<128x128xbf16>, vector<128x128xf32> -> vector<128x128xf32>
    %c0_44 = arith.constant 0 : index
    %c0_45 = arith.constant 0 : index
    %35 = vector.load %arg9[%c0_44, %c0_45] : memref<128x128xf32, #tpu.memory_space<vmem>>, vector<128x128xf32>
    tpu.vector_store %arg9[%c0_44, %c0_45], %34 {strides = array<i32>} : memref<128x128xf32, #tpu.memory_space<vmem>>, vector<128x128xf32>,
    %c0_46 = arith.constant 0 : index
    %c0_47 = arith.constant 0 : index
    %36 = vector.load %arg9[%c0_46, %c0_47] : memref<128x128xf32, #tpu.memory_space<vmem>>, vector<128x128xf32>
    %37 = vector.broadcast %27 : vector<1x128xf32> to vector<128x128xf32>
    %38 = arith.addf %36, %37 : vector<128x128xf32>
    %39 = vector.broadcast %3 : vector<128x1xf32> to vector<128x128xf32>
    %40 = arith.mulf %38, %39 : vector<128x128xf32>
    %cst_48 = arith.constant 0.000000e+00 : f32
    %41 = vector.broadcast %cst_48 : f32 to vector<128x128xf32>
    %42 = arith.maximumf %40, %41 : vector<128x128xf32>
    %43 = arith.truncf %42 : vector<128x128xf32> to vector<128x128xbf16>
    %c0_49 = arith.constant 0 : index
    %c0_50 = arith.constant 0 : index
    %c0_51 = arith.constant 0 : index
    %44 = vector.load %arg8[%c0_49, %c0_50, %c0_51] : memref<1x128x128xbf16, #tpu.memory_space<vmem>>, vector<1x128x128xbf16>
    %45 = vector.shape_cast %44 : vector<1x128x128xbf16> to vector<128x128xbf16>
    %46 = vector.shape_cast %43 : vector<128x128xbf16> to vector<1x128x128xbf16>
    tpu.vector_store %arg8[%c0_49, %c0_50, %c0_51], %46 {strides = array<i32>} : memref<1x128x128xbf16, #tpu.memory_space<vmem>>, vector<1x128x128xbf16>,
    return
  }
  func.func @transform_0(%arg0: i32) -> (i32, i32, i32) {
    %c0_i32 = arith.constant 0 : i32
    %c0_i32_0 = arith.constant 0 : i32
    %c0_i32_1 = arith.constant 0 : i32
    return %arg0, %c0_i32, %c0_i32_0 : i32, i32, i32
  }
  func.func @transform_1(%arg0: i32) -> (i32, i32, i32) {
    %c0_i32 = arith.constant 0 : i32
    %c0_i32_0 = arith.constant 0 : i32
    %c0_i32_1 = arith.constant 0 : i32
    return %arg0, %c0_i32, %c0_i32_0 : i32, i32, i32
  }
  func.func @transform_2(%arg0: i32) -> (i32, i32, i32) {
    %c0_i32 = arith.constant 0 : i32
    %c0_i32_0 = arith.constant 0 : i32
    %c0_i32_1 = arith.constant 0 : i32
    return %arg0, %c0_i32, %c0_i32_0 : i32, i32, i32
  }
  func.func @transform_3(%arg0: i32) -> (i32, i32) {
    %c0_i32 = arith.constant 0 : i32
    %c0_i32_0 = arith.constant 0 : i32
    %c0_i32_1 = arith.constant 0 : i32
    return %c0_i32, %c0_i32_0 : i32, i32
  }
  func.func @transform_4(%arg0: i32) -> (i32, i32) {
    %c0_i32 = arith.constant 0 : i32
    %c0_i32_0 = arith.constant 0 : i32
    %c0_i32_1 = arith.constant 0 : i32
    return %c0_i32, %c0_i32_0 : i32, i32
  }
  func.func @transform_5(%arg0: i32) -> (i32, i32) {
    %c0_i32 = arith.constant 0 : i32
    %c0_i32_0 = arith.constant 0 : i32
    %c0_i32_1 = arith.constant 0 : i32
    return %c0_i32, %c0_i32_0 : i32, i32
  }
  func.func @transform_6(%arg0: i32) -> (i32, i32) {
    %c0_i32 = arith.constant 0 : i32
    %c0_i32_0 = arith.constant 0 : i32
    %c0_i32_1 = arith.constant 0 : i32
    return %c0_i32, %c0_i32_0 : i32, i32
  }
  func.func @transform_7(%arg0: i32) -> (i32, i32, i32) {
    %c0_i32 = arith.constant 0 : i32
    %c0_i32_0 = arith.constant 0 : i32
    %c0_i32_1 = arith.constant 0 : i32
    return %arg0, %c0_i32, %c0_i32_0 : i32, i32, i32
  }
}

</mosaic_0001>

<bundles_post_ra>
// kernel: tpu_custom_call.1
= control target key start
LH: loop header
LB: loop body
LE: loop exit
PB: predicated region body
PF: predicated region fallthrough
CT: control target
= control target key end

     0   :  { %12 = vsyncpa [#allocation5], 0  ;;  %s2621_s0 = inlined_call_operand.vmem [shape: bf16[2,128,128], index: 0, kind: input, shape index: {}]   ;;  %s2622_s1 = inlined_call_operand.vmem [shape: bf16[2,128,128], index: 1, kind: input, shape index: {}]   ;;  %s2623_s2 = inlined_call_operand.vmem [shape: f32[2,128,1], index: 2, kind: input, shape index: {}]   ;;  %s2624_s3 = inlined_call_operand.hbm [shape: bf16[128,128], index: 3, kind: input, shape index: {}]   ;;  %s2625_s4 = inlined_call_operand.hbm [shape: bf16[128,128], index: 4, kind: input, shape index: {}]   ;;  %s2626_s5 = inlined_call_operand.vmem [shape: f32[1,128], index: 5, kind: input, shape index: {}]   ;;  %s2627_s6 = inlined_call_operand.vmem [shape: f32[1,128], index: 6, kind: input, shape index: {}]   ;;  %s2628_s7 = inlined_call_operand.hbm [shape: bf16[2,128,128], index: 7, kind: output, shape index: {}]  }
   0x1   :  { %13 = vsyncpa [#allocation8], 0 }
   0x2   :  { %14 = vsyncpa [#allocation6], 0 }
   0x3   :  { %16 = vsyncpa [#allocation6 + $0x1], 0  ;;  %s2316_s24 = smov 0   ;;  %s2318_s25 = smov 0  }
   0x4   :  { %s2320_s26 = smov 0   ;;  %s2322_s27 = smov 0  }
   0x5 LB: > { %s2337_s28 = sadd.s32 4294967295, %s2267_s27   ;;  %s1575_s29 = sadd.s32 4294967294, %s2267_s27   ;;  %s2267_s27 = sphi %s2322_s27, %s2635_s27   ;;  %s2263_s26 = sphi %s2320_s26, %s2634_s26   ;;  %s2259_s25 = sphi %s2318_s25, %s2633_s25   ;;  %s2255_s24 = sphi %s2316_s24, %s2632_s24  }
   0x6   : > { %s2341_s30 = sadd.s32 1, %s2267_s27   ;;  %s191_s8 = sadd.s32 1, %s2263_s26 }
   0x7   : > { %s188_s9 = ssub.s32 %s2267_s27, %s2341_s30  ;;  %p201_p0 = scmp.ne.s32.totalorder %s2263_s26, %s2259_s25 }
   0x8   : > { %p189_p1 = scmp.eq.s32.totalorder %s188_s9, 0  ;;  %p202_p2 = scmp.eq.s32.totalorder %s2337_s28, 1 }
   0x9   : > { %p207_p3 = scmp.ne.s32.totalorder %s2259_s25, %s2255_s24  ;;  %p208_p4 = scmp.eq.s32.totalorder %s1575_s29, 1 }
   0xa   : > { %s2352_s10 = scalar_select %p189_p1, %s2263_s26, %s191_s8  }
   0xb   : > { %p2354_p5 = por %p202_p2, %p201_p0  ;;  %p2358_p6 = por %p208_p4, %p207_p3 }
   0xc   : > { %p1576_p7 = scmp.ge.s32.totalorder %s2267_s27, 1  ;;  %p215_p8 = scmp.lt.s32.totalorder %s2267_s27, 3 }
   0xd   : > { %p2088_p9 = scmp.eq.s32.totalorder %s2337_s28, 0  ;;  %s226_s16 = sshll.u32 %s2624_s3, 4  ;;  %s227_s16 = int_to_ptr.hbm [resolvable:$true] %s226_s16 }
   0xe   : > { %p2365_p10 = pnand %p1576_p7, %p215_p8  ;;  %s2269_s17 = smov [#allocation4]  }
   0xf   : > { %s228_s18 = sshll.u32 %s2269_s17, 4  ;;  %s240_s21 = sshll.u32 %s2625_s4, 4  ;;  %s229_s18 = int_to_ptr.vmem [resolvable:$true] %s228_s18  ;;  %s241_s21 = int_to_ptr.hbm [resolvable:$true] %s240_s21 }
  0x10   : > { %p2077_p11 = pneg %p2365_p10  ;;  %s2270_s22 = smov 64  }
  0x11   : > { %s2271_s23 = smov 4   ;;  %s2272_s29 = smov [#allocation7]  }
  0x12   : > { %p2078_p12 = pnand %p2088_p9, %p2077_p11  ;;  %s242_s8 = sshll.u32 %s2272_s29, 4  ;;  %s243_s8 = int_to_ptr.vmem [resolvable:$true] %s242_s8 }
  0x13   : > { %288 = sbr.rel (%p2365_p10) target bundleno = 1053 (0x41d), region = 48 }
  0x14   : > { %2080 = dma.hbm_to_vmem [thread:$0]  (!%p2078_p12), %s227_s16, 1024, %s229_s18, [#allocation5], %s2270_s22, %s2270_s22, %s2271_s23  }
  0x15   : > { %2083 = dma.hbm_to_vmem [thread:$0]  (!%p2078_p12), %s241_s21, 1024, %s243_s8, [#allocation8], %s2270_s22, %s2270_s22, %s2271_s23  }
  0x18   : > { %2242 = dma.done.wait (%p2088_p9), [#allocation5], 1024  }
  0x19   : > { %2244 = vsyncadd (%p2088_p9), [#allocation5], 4294966272 }
  0x1a   : > { %2246 = dma.done.wait (%p2088_p9), [#allocation8], 1024  }
  0x1b   : > { %2248 = vsyncadd (%p2088_p9), [#allocation8], 4294966272  ;;  %v1845_v0 = vld [vmem:[#allocation4 + $0x38] sm:$0xff]  ;;  %v1844_v1 = vld [vmem:[#allocation4 + $0x30] sm:$0xff]  ;;  %p336_p13 = scmp.lt.s32.totalorder %s2337_s28, 1  ;;  %v2273_v35 = vmov 0  }
  0x1c   : > { %512 = vmatpush.bf16.msra.mxu0 %v1845_v0  ;;  %v1843_v2 = vld [vmem:[#allocation4 + $0x28] sm:$0xff]  ;;  %v1842_v3 = vld [vmem:[#allocation4 + $0x20] sm:$0xff]  ;;  %v1841_v4 = vld [vmem:[#allocation4 + $0x18] sm:$0xff]  ;;  %2132 = vset.pattern.permute.xlu0 %v2273_v35  ;;  %s333_s14 = sand.u32 1, %s2259_s25  }
  0x1d   : > { %v1840_v5 = vld [vmem:[#allocation4 + $0x10] sm:$0xff]  ;;  %s2391_s9 = scalar_select %p336_p13, %s2337_s28, 1  ;;  %v1839_v6 = vld [vmem:[#allocation4 + $0x8] sm:$0xff]  ;;  %v1838_v7 = vld [vmem:[#allocation4] sm:$0xff]  ;;  %2133 = vset.pattern.permute.xlu1 %v2273_v35  ;;  %2134 = vset.pattern.permute.xlu2 %v2273_v35 }
  0x1e   : > { %s1583_s15 = sshll.u32 %s333_s14, 6 }
  0x1f   : > { %s1819_s13 = sshll.u32 %s2391_s9, 6  ;;  %s1821_s17 = sshll.u32 %s2391_s9, 7 }
  0x20   : > { %513 = vmatpush.bf16.msra.mxu0 %v1844_v1  ;;  %s345_s16 = scalar_lea.vmem %s2622_s1, %s1819_s13  ;;  %s2403_s20 = scalar_lea.vmem %s2623_s2, %s1821_s17 }
  0x21   : > { %v1830_v8 = vld [vmem:[%s345_s16] sm:$0xff]  ;;  %v1831_v9 = vld [vmem:[%s345_s16 + $0x8] sm:$0xff]  ;;  %v1832_v10 = vld [vmem:[%s345_s16 + $0x10] sm:$0xff]  ;;  %s2420_s23 = scalar_lea.vmem %s2621_s0, %s1819_s13  ;;  %s1878_s17 = sshll.u32 %s2337_s28, 6 }
  0x22   : > { %v1833_v11 = vld [vmem:[%s345_s16 + $0x18] sm:$0xff]  ;;  %v1834_v12 = vld [vmem:[%s345_s16 + $0x20] sm:$0xff]  ;;  %v1835_v13 = vld [vmem:[%s345_s16 + $0x28] sm:$0xff]  ;;  %s1452_s28 = scalar_lea.sflag [#allocation6], %s333_s14  ;;  %s2217_s13 = scalar_lea.hbm %s2628_s7, 128 }
  0x23   : > { %v1836_v14 = vld [vmem:[%s345_s16 + $0x30] sm:$0xff]  ;;  %v1837_v15 = vld [vmem:[%s345_s16 + $0x38] sm:$0xff]  ;;  %v367_v36 = vld [vmem:[%s2403_s20] sm:$0xff]  ;;  %s2549_s16 = scalar_lea.vmem [#allocation9], %s1583_s15 }
  0x24   : > { %514 = vmatpush.bf16.msra.mxu0 %v1843_v2  ;;  %839 = vperm.xlu0 %2132, %v367_v36   ;;  %v368_v39 = vld [vmem:[%s2403_s20 + $0x8] sm:$0xff]  ;;  %v373_v41 = vld [vmem:[%s2403_s20 + $0x30] sm:$0xff]  ;;  %v370_v47 = vld [vmem:[%s2403_s20 + $0x18] sm:$0xff]  ;;  %s1464_s21 = sshll.u32 %s2549_s16, 4  ;;  %s1465_s21 = int_to_ptr.vmem [resolvable:$true] %s1464_s21 }
  0x25   : > { %v369_v44 = vld [vmem:[%s2403_s20 + $0x10] sm:$0xff]  ;;  %v376_v45 = vld [vmem:[%s2403_s20 + $0x48] sm:$0xff]  ;;  %v379_v49 = vld [vmem:[%s2403_s20 + $0x60] sm:$0xff] }
  0x26   : > { %849 = vperm.xlu1 %2133, %v369_v44   ;;  %v374_v51 = vld [vmem:[%s2403_s20 + $0x38] sm:$0xff]  ;;  %v377_v55 = vld [vmem:[%s2403_s20 + $0x50] sm:$0xff]  ;;  %v380_v58 = vld [vmem:[%s2403_s20 + $0x68] sm:$0xff] }
  0x27   : > { %v382_v53 = vld [vmem:[%s2403_s20 + $0x78] sm:$0xff]  ;;  %v2424_v60 = vld [vmem:[%s2420_s23] sm:$0xff]  ;;  %v372_v62 = vld [vmem:[%s2403_s20 + $0x28] sm:$0xff] }
  0x28   : > { %515 = vmatpush.bf16.msra.mxu0 %v1842_v3  ;;  %v371_v61 = vld [vmem:[%s2403_s20 + $0x20] sm:$0xff]  ;;  %v2430_v63 = vld [vmem:[%s2420_s23 + $0x8] sm:$0xff]  ;;  %v378_v1 = vld [vmem:[%s2403_s20 + $0x58] sm:$0xff] }
  0x29   : > { %859 = vperm.xlu2 %2134, %v371_v61   ;;  %v375_v0 = vld [vmem:[%s2403_s20 + $0x40] sm:$0xff]  ;;  %v2436_v2 = vld [vmem:[%s2420_s23 + $0x10] sm:$0xff] }
  0x2a   : > { %v381_v3 = vld [vmem:[%s2403_s20 + $0x70] sm:$0xff]  ;;  %s1463_s20 = scalar_lea.hbm %s2628_s7, %s1878_s17 }
  0x2b   : > { %s1466_s22 = sshll.u32 %s1463_s20, 4  ;;  %s1467_s22 = int_to_ptr.hbm [resolvable:$true] %s1466_s22 }
  0x2c   : > { %516 = vmatpush.bf16.msra.mxu0 %v1841_v4  ;;  %844 = vperm.xlu0 %2132, %v368_v39   ;;  %v2441_v4 = vld [vmem:[%s2420_s23 + $0x18] sm:$0xff] }
  0x2e   : > { %854 = vperm.xlu1 %2133, %v370_v47  }
  0x30   : > { %517 = vmatpush.bf16.msra.mxu0 %v1840_v5  ;;  %v2445_v5 = vld [vmem:[%s2420_s23 + $0x20] sm:$0xff] }
  0x31   : > { %864 = vperm.xlu2 %2134, %v372_v62  }
  0x34   : > { %518 = vmatpush.bf16.msra.mxu0 %v1839_v6  ;;  %869 = vperm.xlu0 %2132, %v373_v41   ;;  %v2449_v6 = vld [vmem:[%s2420_s23 + $0x28] sm:$0xff] }
  0x36   : > { %874 = vperm.xlu1 %2133, %v374_v51  }
  0x38   : > { %519 = vmatpush.bf16.msra.mxu0 %v1838_v7  ;;  %v1869_v7 = vld [vmem:[#allocation7 + $0x38] sm:$0xff] }
  0x39   : > { %879 = vperm.xlu2 %2134, %v375_v0   ;;  %1110 = vmatpush.bf16.msra.mxu2 %v1869_v7 }
  0x3b   : > { %520 = vmatmul.bf16.vlgmr.msra.gmra.mxu0 %v1830_v8  ;;  %v1868_v8 = vld [vmem:[#allocation7 + $0x30] sm:$0xff] }
  0x3c   : > { %884 = vperm.xlu0 %2132, %v376_v45  }
  0x3d   : > { %1111 = vmatpush.bf16.msra.mxu2 %v1868_v8 }
  0x3e   : > { %889 = vperm.xlu1 %2133, %v377_v55  }
  0x41   : > { %894 = vperm.xlu2 %2134, %v378_v1  }
  0x44   : > { %899 = vperm.xlu0 %2132, %v379_v49  }
  0x46   : > { %904 = vperm.xlu1 %2133, %v380_v58  }
  0x49   : > { %909 = vperm.xlu2 %2134, %v381_v3  }
  0x4b   : > { %525 = vmatmul.bf16.gmra.mxu0 %v1831_v9  ;;  %v2453_v9 = vld [vmem:[%s2420_s23 + $0x30] sm:$0xff] }
  0x4c   : > { %914 = vperm.xlu0 %2132, %v382_v53  }
  0x5b   : > { %530 = vmatmul.bf16.gmra.mxu0 %v1832_v10  ;;  %v1867_v10 = vld [vmem:[#allocation7 + $0x28] sm:$0xff] }
  0x5c   : > { %1112 = vmatpush.bf16.msra.mxu2 %v1867_v10 }
  0x6b   : > { %535 = vmatmul.bf16.gmra.mxu0 %v1833_v11  ;;  %v1866_v11 = vld [vmem:[#allocation7 + $0x20] sm:$0xff] }
  0x6c   : > { %1113 = vmatpush.bf16.msra.mxu2 %v1866_v11 }
  0x7b   : > { %540 = vmatmul.bf16.gmra.mxu0 %v1834_v12  ;;  %v1865_v12 = vld [vmem:[#allocation7 + $0x18] sm:$0xff] }
  0x7c   : > { %1114 = vmatpush.bf16.msra.mxu2 %v1865_v12 }
  0x83   : > { %v2481_v41 = vpop.permute.xlu2 %859 }
  0x8b   : > { %545 = vmatmul.bf16.gmra.mxu0 %v1835_v13  ;;  %v1864_v13 = vld [vmem:[#allocation7 + $0x10] sm:$0xff] }
  0x8c   : > { %1115 = vmatpush.bf16.msra.mxu2 %v1864_v13 }
  0x9b   : > { %550 = vmatmul.bf16.gmra.mxu0 %v1836_v14  ;;  %v2457_v14 = vld [vmem:[%s2420_s23 + $0x38] sm:$0xff]  ;;  %s2211_s23 = sshra.s32 %s1467_s22, 4  ;;  %s2212_s23 = int_to_ptr.hbm [resolvable:$true] %s2211_s23 }
  0x9c   : > { %s2213_s29 = scalar_lea.hbm %s2212_s23, 64  ;;  %p2218_p3 = scmp.lt.s32.totalorder %s2212_s23, %s2628_s7 }
  0x9d   : > { %p2214_p0 = scmp.ne.s32.totalorder %s2212_s23, %s2213_s29  ;;  %p2219_p4 = scmp.lt.s32.totalorder %s2217_s13, %s2213_s29 }
  0x9f   : > { %p2215_p1 = pnand %p2214_p0, %p2354_p5  ;;  %p2220_p7 = por %p2219_p4, %p2218_p3 }
  0xa1   : > { %p2216_p2 = pneg %p2215_p1 }
  0xa3   : > { %p2221_p8 = pnand %p2220_p7, %p2216_p2 }
  0xab   : > { %555 = vmatmul.bf16.gmra.mxu0 %v1837_v15  ;;  %v1863_v15 = vld [vmem:[#allocation7 + $0x8] sm:$0xff] }
  0xac   : > { %1116 = vmatpush.bf16.msra.mxu2 %v1863_v15 }
  0xb8   : > { %v521_v16 = vpop.f32.mrf.mxu0 }
  0xc0   : > { %v523_v17 = vpop.f32.mrf.mxu0 }
  0xc1   : > { %v1882_v18 = vpack.c.bf16 %v523_v17, %v521_v16  ;;  %v1862_v16 = vld [vmem:[#allocation7] sm:$0xff]  ;;  %v2460_v17 = vpop.permute.xlu0 %839 }
  0xc2   : > { %1117 = vmatpush.bf16.msra.mxu2 %v1862_v16 }
  0xc3   : > { %1883 = vst [vmem:[#allocation3 + $0x30] sm:$0xff] %v1882_v18  }
  0xc8   : > { %v526_v19 = vpop.f32.mrf.mxu0 }
  0xca   : > { %v1846_v59 = vld [vmem:[#allocation3 + $0x30] sm:$0xff] }
  0xd0   : > { %v528_v20 = vpop.f32.mrf.mxu0 }
  0xd1   : > { %v1887_v21 = vpack.c.bf16 %v528_v20, %v526_v19  ;;  %v2465_v19 = vld [vmem:[%s2626_s5] ss:$0 sm:$0xff] }
  0xd3   : > { %2039 = vst [vmem:[#allocation3] sm:$0xff] %v1887_v21  }
  0xd8   : > { %v531_v22 = vpop.f32.mrf.mxu0 }
  0xda   : > { %v1847_v57 = vld [vmem:[#allocation3] sm:$0xff] }
  0xe0   : > { %v533_v23 = vpop.f32.mrf.mxu0 }
  0xe1   : > { %v1892_v24 = vpack.c.bf16 %v533_v23, %v531_v22 }
  0xe3   : > { %2040 = vst [vmem:[#allocation3 + $0x18] sm:$0xff] %v1892_v24   ;;  %v2470_v24 = vpop.permute.xlu0 %844 }
  0xe8   : > { %v536_v25 = vpop.f32.mrf.mxu0 }
  0xea   : > { %v1848_v56 = vld [vmem:[#allocation3 + $0x18] sm:$0xff] }
  0xeb   : > { %v2490_v55 = vpop.permute.xlu0 %869 }
  0xf0   : > { %v538_v26 = vpop.f32.mrf.mxu0 }
  0xf1   : > { %v1897_v27 = vpack.c.bf16 %v538_v26, %v536_v25 }
  0xf3   : > { %2041 = vst [vmem:[#allocation3 + $0x10] sm:$0xff] %v1897_v27   ;;  %v2502_v16 = vpop.permute.xlu0 %884 }
  0xf8   : > { %v541_v28 = vpop.f32.mrf.mxu0 }
  0xfa   : > { %v1849_v54 = vld [vmem:[#allocation3 + $0x10] sm:$0xff] }
 0x100   : > { %v543_v29 = vpop.f32.mrf.mxu0 }
 0x101   : > { %v1902_v30 = vpack.c.bf16 %v543_v29, %v541_v28  ;;  %v2473_v29 = vpop.permute.xlu1 %849 }
 0x103   : > { %2042 = vst [vmem:[#allocation3 + $0x8] sm:$0xff] %v1902_v30  }
 0x108   : > { %v546_v31 = vpop.f32.mrf.mxu0 }
 0x109   : > { %v2478_v36 = vpop.permute.xlu1 %854 }
 0x10a   : > { %v1850_v52 = vld [vmem:[#allocation3 + $0x8] sm:$0xff] }
 0x110   : > { %v548_v32 = vpop.f32.mrf.mxu0 }
 0x111   : > { %v1907_v33 = vpack.c.bf16 %v548_v32, %v546_v31  ;;  %v2494_v61 = vpop.permute.xlu1 %874 }
 0x113   : > { %2043 = vst [vmem:[#allocation3 + $0x20] sm:$0xff] %v1907_v33  }
 0x118   : > { %v551_v34 = vpop.f32.mrf.mxu0 }
 0x11a   : > { %v1851_v50 = vld [vmem:[#allocation3 + $0x20] sm:$0xff] }
 0x120   : > { %v553_v37 = vpop.f32.mrf.mxu0 }
 0x121   : > { %v1912_v38 = vpack.c.bf16 %v553_v37, %v551_v34 }
 0x123   : > { %2044 = vst [vmem:[#allocation3 + $0x28] sm:$0xff] %v1912_v38  }
 0x128   : > { %v556_v40 = vpop.f32.mrf.mxu0 }
 0x12a   : > { %v1852_v48 = vld [vmem:[#allocation3 + $0x28] sm:$0xff] }
 0x130   : > { %v558_v42 = vpop.f32.mrf.mxu0 }
 0x131   : > { %v1917_v43 = vpack.c.bf16 %v558_v42, %v556_v40 }
 0x133   : > { %2045 = vst [vmem:[#allocation3 + $0x38] sm:$0xff] %v1917_v43  }
 0x13a   : > { %v1853_v46 = vld [vmem:[#allocation3 + $0x38] sm:$0xff] }
 0x13b   : > { %737 = vmatpush.bf16.msra.mxu1 %v1853_v46 }
 0x13f   : > { %738 = vmatpush.bf16.msra.mxu1 %v1852_v48  ;;  %v2486_v48 = vpop.permute.xlu2 %864 }
 0x143   : > { %739 = vmatpush.bf16.msra.mxu1 %v1851_v50 }
 0x147   : > { %740 = vmatpush.bf16.msra.mxu1 %v1850_v52  ;;  %v2498_v10 = vpop.permute.xlu2 %879 }
 0x14b   : > { %741 = vmatpush.bf16.msra.mxu1 %v1849_v54 }
 0x14f   : > { %742 = vmatpush.bf16.msra.mxu1 %v1848_v56 }
 0x153   : > { %743 = vmatpush.bf16.msra.mxu1 %v1847_v57 }
 0x157   : > { %744 = vmatpush.bf16.msra.mxu1 %v1846_v59 }
 0x15a   : > { %745 = vmatmul.bf16.vlgmr.msra.gmra.mxu1 %v2424_v60 }
 0x16a   : > { %750 = vmatmul.bf16.gmra.mxu1 %v2430_v63 }
 0x17a   : > { %755 = vmatmul.bf16.gmra.mxu1 %v2436_v2 }
 0x18a   : > { %760 = vmatmul.bf16.gmra.mxu1 %v2441_v4 }
 0x19a   : > { %765 = vmatmul.bf16.gmra.mxu1 %v2445_v5 }
 0x1aa   : > { %770 = vmatmul.bf16.gmra.mxu1 %v2449_v6 }
 0x1ba   : > { %775 = vmatmul.bf16.gmra.mxu1 %v2453_v9 }
 0x1ca   : > { %780 = vmatmul.bf16.gmra.mxu1 %v2457_v14 }
 0x1d7   : > { %v746_v18 = vpop.f32.mrf.mxu1 }
 0x1d8   : > { %v821_v20 = vadd.f32 %v2465_v19, %v746_v18 }
 0x1da   : > { %v917_v22 = vmul.f32 %v2460_v17, %v821_v20 }
 0x1dc   : > { %v933_v26 = vmax.f32 %v917_v22, 0.0 }
 0x1df   : > { %v748_v21 = vpop.f32.mrf.mxu1 }
 0x1e0   : > { %v822_v23 = vadd.f32 %v2465_v19, %v748_v21 }
 0x1e2   : > { %v918_v25 = vmul.f32 %v2470_v24, %v822_v23 }
 0x1e4   : > { %v934_v27 = vmax.f32 %v918_v25, 0.0 }
 0x1e6   : > { %v1922_v28 = vpack.c.bf16 %v934_v27, %v933_v26  ;;  %v2506_v26 = vpop.permute.xlu1 %889 }
 0x1e7   : > { %v751_v30 = vpop.f32.mrf.mxu1 }
 0x1e8   : > { %1923 = vst [vmem:[#allocation3 + $0x30] sm:$0xff] %v1922_v28   ;;  %v823_v31 = vadd.f32 %v2465_v19, %v751_v30 }
 0x1ea   : > { %v919_v34 = vmul.f32 %v2473_v29, %v823_v31 }
 0x1ec   : > { %v935_v38 = vmax.f32 %v919_v34, 0.0 }
 0x1ef   : > { %v753_v32 = vpop.f32.mrf.mxu1  ;;  %v1854_v33 = vld [vmem:[#allocation3 + $0x30] sm:$0xff] }
 0x1f0   : > { %v824_v35 = vadd.f32 %v2465_v19, %v753_v32  ;;  %1118 = vmatmul.bf16.vlgmr.msra.gmra.mxu2 %v1854_v33  ;;  %v2510_v32 = vpop.permute.xlu2 %894 }
 0x1f2   : > { %v920_v37 = vmul.f32 %v2478_v36, %v824_v35 }
 0x1f4   : > { %v936_v39 = vmax.f32 %v920_v37, 0.0 }
 0x1f6   : > { %v1927_v40 = vpack.c.bf16 %v936_v39, %v935_v38 }
 0x1f7   : > { %v756_v42 = vpop.f32.mrf.mxu1 }
 0x1f8   : > { %2046 = vst [vmem:[#allocation3] sm:$0xff] %v1927_v40   ;;  %v825_v43 = vadd.f32 %v2465_v19, %v756_v42  ;;  %v2514_v40 = vpop.permute.xlu0 %899 }
 0x1fa   : > { %v921_v46 = vmul.f32 %v2481_v41, %v825_v43 }
 0x1fc   : > { %v937_v50 = vmax.f32 %v921_v46, 0.0  ;;  %v2518_v46 = vpop.permute.xlu1 %904 }
 0x1ff   : > { %v758_v44 = vpop.f32.mrf.mxu1  ;;  %v1855_v45 = vld [vmem:[#allocation3] sm:$0xff] }
 0x200   : > { %v826_v47 = vadd.f32 %v2465_v19, %v758_v44  ;;  %1123 = vmatmul.bf16.gmra.mxu2 %v1855_v45 }
 0x202   : > { %v922_v49 = vmul.f32 %v2486_v48, %v826_v47 }
 0x204   : > { %v938_v51 = vmax.f32 %v922_v49, 0.0 }
 0x206   : > { %v1932_v52 = vpack.c.bf16 %v938_v51, %v937_v50 }
 0x207   : > { %v761_v53 = vpop.f32.mrf.mxu1 }
 0x208   : > { %2047 = vst [vmem:[#allocation3 + $0x18] sm:$0xff] %v1932_v52   ;;  %v827_v54 = vadd.f32 %v2465_v19, %v761_v53 }
 0x20a   : > { %v923_v58 = vmul.f32 %v2490_v55, %v827_v54  ;;  %v2522_v54 = vpop.permute.xlu2 %909 }
 0x20c   : > { %v939_v0 = vmax.f32 %v923_v58, 0.0 }
 0x20f   : > { %v763_v56 = vpop.f32.mrf.mxu1  ;;  %v1856_v57 = vld [vmem:[#allocation3 + $0x18] sm:$0xff] }
 0x210   : > { %v828_v59 = vadd.f32 %v2465_v19, %v763_v56  ;;  %1128 = vmatmul.bf16.gmra.mxu2 %v1856_v57 }
 0x212   : > { %v924_v62 = vmul.f32 %v2494_v61, %v828_v59 }
 0x214   : > { %v940_v1 = vmax.f32 %v924_v62, 0.0  ;;  %v2526_v62 = vpop.permute.xlu0 %914 }
 0x216   : > { %v1937_v3 = vpack.c.bf16 %v940_v1, %v939_v0 }
 0x217   : > { %v766_v7 = vpop.f32.mrf.mxu1 }
 0x218   : > { %2048 = vst [vmem:[#allocation3 + $0x10] sm:$0xff] %v1937_v3   ;;  %v829_v8 = vadd.f32 %v2465_v19, %v766_v7 }
 0x21a   : > { %v925_v13 = vmul.f32 %v2498_v10, %v829_v8 }
 0x21c   : > { %v941_v20 = vmax.f32 %v925_v13, 0.0 }
 0x21f   : > { %v768_v11 = vpop.f32.mrf.mxu1  ;;  %v1857_v12 = vld [vmem:[#allocation3 + $0x10] sm:$0xff] }
 0x220   : > { %v830_v15 = vadd.f32 %v2465_v19, %v768_v11  ;;  %1133 = vmatmul.bf16.gmra.mxu2 %v1857_v12 }
 0x222   : > { %v926_v18 = vmul.f32 %v2502_v16, %v830_v15 }
 0x224   : > { %v942_v21 = vmax.f32 %v926_v18, 0.0 }
 0x226   : > { %v1942_v22 = vpack.c.bf16 %v942_v21, %v941_v20 }
 0x227   : > { %v771_v23 = vpop.f32.mrf.mxu1 }
 0x228   : > { %2049 = vst [vmem:[#allocation3 + $0x8] sm:$0xff] %v1942_v22   ;;  %v831_v25 = vadd.f32 %v2465_v19, %v771_v23 }
 0x22a   : > { %v927_v30 = vmul.f32 %v2506_v26, %v831_v25 }
 0x22c   : > { %v943_v34 = vmax.f32 %v927_v30, 0.0 }
 0x22f   : > { %v773_v27 = vpop.f32.mrf.mxu1  ;;  %v1858_v28 = vld [vmem:[#allocation3 + $0x8] sm:$0xff] }
 0x230   : > { %v832_v31 = vadd.f32 %v2465_v19, %v773_v27  ;;  %1138 = vmatmul.bf16.gmra.mxu2 %v1858_v28 }
 0x232   : > { %v928_v33 = vmul.f32 %v2510_v32, %v832_v31 }
 0x234   : > { %v944_v35 = vmax.f32 %v928_v33, 0.0 }
 0x236   : > { %v1947_v37 = vpack.c.bf16 %v944_v35, %v943_v34 }
 0x237   : > { %v776_v38 = vpop.f32.mrf.mxu1 }
 0x238   : > { %2050 = vst [vmem:[#allocation3 + $0x20] sm:$0xff] %v1947_v37   ;;  %v833_v39 = vadd.f32 %v2465_v19, %v776_v38 }
 0x23a   : > { %v929_v44 = vmul.f32 %v2514_v40, %v833_v39 }
 0x23c   : > { %v945_v49 = vmax.f32 %v929_v44, 0.0 }
 0x23f   : > { %v778_v42 = vpop.f32.mrf.mxu1  ;;  %v1859_v43 = vld [vmem:[#allocation3 + $0x20] sm:$0xff] }
 0x240   : > { %v834_v45 = vadd.f32 %v2465_v19, %v778_v42  ;;  %1143 = vmatmul.bf16.gmra.mxu2 %v1859_v43 }
 0x242   : > { %v930_v47 = vmul.f32 %v2518_v46, %v834_v45 }
 0x244   : > { %v946_v50 = vmax.f32 %v930_v47, 0.0 }
 0x246   : > { %v1952_v51 = vpack.c.bf16 %v946_v50, %v945_v49 }
 0x247   : > { %v781_v52 = vpop.f32.mrf.mxu1 }
 0x248   : > { %2051 = vst [vmem:[#allocation3 + $0x28] sm:$0xff] %v1952_v51   ;;  %v835_v53 = vadd.f32 %v2465_v19, %v781_v52 }
 0x24a   : > { %v931_v58 = vmul.f32 %v2522_v54, %v835_v53 }
 0x24c   : > { %v947_v1 = vmax.f32 %v931_v58, 0.0  ;;  %v2540_v58 = vld [vmem:[%s2627_s6] ss:$0 sm:$0xff] }
 0x24f   : > { %v783_v56 = vpop.f32.mrf.mxu1  ;;  %v1860_v57 = vld [vmem:[#allocation3 + $0x28] sm:$0xff] }
 0x250   : > { %v836_v59 = vadd.f32 %v2465_v19, %v783_v56  ;;  %1148 = vmatmul.bf16.gmra.mxu2 %v1860_v57 }
 0x252   : > { %v932_v0 = vmul.f32 %v2526_v62, %v836_v59 }
 0x254   : > { %v948_v3 = vmax.f32 %v932_v0, 0.0 }
 0x256   : > { %v1957_v7 = vpack.c.bf16 %v948_v3, %v947_v1 }
 0x258   : > { %2052 = vst [vmem:[#allocation3 + $0x38] sm:$0xff] %v1957_v7  }
 0x25f   : > { %v1861_v8 = vld [vmem:[#allocation3 + $0x38] sm:$0xff] }
 0x260   : > { %1153 = vmatmul.bf16.gmra.mxu2 %v1861_v8 }
 0x273   : > { %v1119_v11 = vpop.f32.mrf.mxu2 }
 0x27b   : > { %v1121_v12 = vpop.f32.mrf.mxu2 }
 0x27c   : > { %v1962_v13 = vpack.c.bf16 %v1121_v12, %v1119_v11 }
 0x27e   : > { %1963 = vst [vmem:[#allocation3 + $0x30] sm:$0xff] %v1962_v13  }
 0x283   : > { %v1124_v15 = vpop.f32.mrf.mxu2 }
 0x285   : > { %v1870_v56 = vld [vmem:[#allocation3 + $0x30] sm:$0xff] }
 0x28b   : > { %v1126_v18 = vpop.f32.mrf.mxu2 }
 0x28c   : > { %v1967_v20 = vpack.c.bf16 %v1126_v18, %v1124_v15 }
 0x28e   : > { %2053 = vst [vmem:[#allocation3] sm:$0xff] %v1967_v20  }
 0x293   : > { %v1129_v19 = vpop.f32.mrf.mxu2 }
 0x295   : > { %v1871_v53 = vld [vmem:[#allocation3] sm:$0xff] }
 0x29b   : > { %v1131_v21 = vpop.f32.mrf.mxu2 }
 0x29c   : > { %v1972_v22 = vpack.c.bf16 %v1131_v21, %v1129_v19 }
 0x29e   : > { %2054 = vst [vmem:[#allocation3 + $0x18] sm:$0xff] %v1972_v22  }
 0x2a3   : > { %v1134_v23 = vpop.f32.mrf.mxu2 }
 0x2a5   : > { %v1872_v52 = vld [vmem:[#allocation3 + $0x18] sm:$0xff] }
 0x2ab   : > { %v1136_v25 = vpop.f32.mrf.mxu2 }
 0x2ac   : > { %v1977_v27 = vpack.c.bf16 %v1136_v25, %v1134_v23 }
 0x2ae   : > { %2055 = vst [vmem:[#allocation3 + $0x10] sm:$0xff] %v1977_v27  }
 0x2b3   : > { %v1139_v28 = vpop.f32.mrf.mxu2 }
 0x2b5   : > { %v1873_v51 = vld [vmem:[#allocation3 + $0x10] sm:$0xff] }
 0x2bb   : > { %v1141_v30 = vpop.f32.mrf.mxu2 }
 0x2bc   : > { %v1982_v31 = vpack.c.bf16 %v1141_v30, %v1139_v28 }
 0x2be   : > { %2056 = vst [vmem:[#allocation3 + $0x8] sm:$0xff] %v1982_v31  }
 0x2c3   : > { %v1144_v33 = vpop.f32.mrf.mxu2 }
 0x2c5   : > { %v1874_v50 = vld [vmem:[#allocation3 + $0x8] sm:$0xff] }
 0x2cb   : > { %v1146_v34 = vpop.f32.mrf.mxu2 }
 0x2cc   : > { %v1987_v35 = vpack.c.bf16 %v1146_v34, %v1144_v33 }
 0x2ce   : > { %2057 = vst [vmem:[#allocation3 + $0x20] sm:$0xff] %v1987_v35  }
 0x2d3   : > { %v1149_v37 = vpop.f32.mrf.mxu2 }
 0x2d5   : > { %v1875_v49 = vld [vmem:[#allocation3 + $0x20] sm:$0xff] }
 0x2db   : > { %v1151_v38 = vpop.f32.mrf.mxu2 }
 0x2dc   : > { %v1992_v39 = vpack.c.bf16 %v1151_v38, %v1149_v37 }
 0x2de   : > { %2058 = vst [vmem:[#allocation3 + $0x28] sm:$0xff] %v1992_v39  }
 0x2e3   : > { %v1154_v42 = vpop.f32.mrf.mxu2 }
 0x2e5   : > { %v1876_v47 = vld [vmem:[#allocation3 + $0x28] sm:$0xff] }
 0x2eb   : > { %v1156_v43 = vpop.f32.mrf.mxu2 }
 0x2ec   : > { %v1997_v44 = vpack.c.bf16 %v1156_v43, %v1154_v42 }
 0x2ee   : > { %2059 = vst [vmem:[#allocation3 + $0x38] sm:$0xff] %v1997_v44  }
 0x2f5   : > { %v1877_v45 = vld [vmem:[#allocation3 + $0x38] sm:$0xff] }
 0x2f6   : > { %1287 = vmatpush.bf16.msra.mxu3 %v1877_v45 }
 0x2fa   : > { %1288 = vmatpush.bf16.msra.mxu3 %v1876_v47 }
 0x2fe   : > { %1289 = vmatpush.bf16.msra.mxu3 %v1875_v49 }
 0x302   : > { %1290 = vmatpush.bf16.msra.mxu3 %v1874_v50 }
 0x306   : > { %1291 = vmatpush.bf16.msra.mxu3 %v1873_v51 }
 0x30a   : > { %1292 = vmatpush.bf16.msra.mxu3 %v1872_v52 }
 0x30e   : > { %1293 = vmatpush.bf16.msra.mxu3 %v1871_v53 }
 0x312   : > { %1294 = vmatpush.bf16.msra.mxu3 %v1870_v56 }
 0x315   : > { %1295 = vmatmul.bf16.vlgmr.msra.gmra.mxu3 %v2424_v60 }
 0x325   : > { %1300 = vmatmul.bf16.gmra.mxu3 %v2430_v63 }
 0x335   : > { %1305 = vmatmul.bf16.gmra.mxu3 %v2436_v2 }
 0x345   : > { %1310 = vmatmul.bf16.gmra.mxu3 %v2441_v4 }
 0x355   : > { %1315 = vmatmul.bf16.gmra.mxu3 %v2445_v5 }
 0x365   : > { %1320 = vmatmul.bf16.gmra.mxu3 %v2449_v6 }
 0x375   : > { %1325 = vmatmul.bf16.gmra.mxu3 %v2453_v9 }
 0x385   : > { %1330 = vmatmul.bf16.gmra.mxu3 %v2457_v14 }
 0x398   : > { %v1296_v57 = vpop.f32.mrf.mxu3 }
 0x399   : > { %v1371_v60 = vadd.f32 %v2540_v58, %v1296_v57 }
 0x39b   : > { %v1387_v2 = vmul.f32 %v1371_v60, %v2460_v17 }
 0x39d   : > { %v1403_v6 = vmax.f32 %v1387_v2, 0.0 }
 0x3a0   : > { %v1298_v63 = vpop.f32.mrf.mxu3 }
 0x3a1   : > { %v1372_v4 = vadd.f32 %v2540_v58, %v1298_v63 }
 0x3a3   : > { %v1388_v5 = vmul.f32 %v1372_v4, %v2470_v24 }
 0x3a5   : > { %v1404_v9 = vmax.f32 %v1388_v5, 0.0 }
 0x3a7   : > { %v2002_v14 = vpack.c.bf16 %v1404_v9, %v1403_v6 }
 0x3a8   : > { %v1301_v59 = vpop.f32.mrf.mxu3 }
 0x3a9   : > { %2003 = vst [vmem:[%s2549_s16] sm:$0xff] %v2002_v14   ;;  %v1373_v0 = vadd.f32 %v2540_v58, %v1301_v59 }
 0x3ab   : > { %v1389_v17 = vmul.f32 %v1373_v0, %v2473_v29 }
 0x3ad   : > { %v1405_v24 = vmax.f32 %v1389_v17, 0.0 }
 0x3b0   : > { %v1303_v1 = vpop.f32.mrf.mxu3 }
 0x3b1   : > { %v1374_v3 = vadd.f32 %v2540_v58, %v1303_v1 }
 0x3b3   : > { %v1390_v7 = vmul.f32 %v1374_v3, %v2478_v36 }
 0x3b5   : > { %v1406_v8 = vmax.f32 %v1390_v7, 0.0 }
 0x3b7   : > { %v2007_v11 = vpack.c.bf16 %v1406_v8, %v1405_v24 }
 0x3b8   : > { %v1306_v12 = vpop.f32.mrf.mxu3 }
 0x3b9   : > { %2060 = vst [vmem:[%s2549_s16 + $0x8] sm:$0xff] %v2007_v11   ;;  %v1375_v13 = vadd.f32 %v2540_v58, %v1306_v12 }
 0x3bb   : > { %v1391_v18 = vmul.f32 %v1375_v13, %v2481_v41 }
 0x3bd   : > { %v1407_v19 = vmax.f32 %v1391_v18, 0.0 }
 0x3c0   : > { %v1308_v15 = vpop.f32.mrf.mxu3 }
 0x3c1   : > { %v1376_v20 = vadd.f32 %v2540_v58, %v1308_v15 }
 0x3c3   : > { %v1392_v29 = vmul.f32 %v1376_v20, %v2486_v48 }
 0x3c5   : > { %v1408_v21 = vmax.f32 %v1392_v29, 0.0 }
 0x3c7   : > { %v2012_v22 = vpack.c.bf16 %v1408_v21, %v1407_v19 }
 0x3c8   : > { %v1311_v23 = vpop.f32.mrf.mxu3 }
 0x3c9   : > { %2061 = vst [vmem:[%s2549_s16 + $0x10] sm:$0xff] %v2012_v22   ;;  %v1377_v36 = vadd.f32 %v2540_v58, %v1311_v23 }
 0x3cb   : > { %v1393_v27 = vmul.f32 %v1377_v36, %v2490_v55 }
 0x3cd   : > { %v1409_v30 = vmax.f32 %v1393_v27, 0.0 }
 0x3d0   : > { %v1313_v25 = vpop.f32.mrf.mxu3 }
 0x3d1   : > { %v1378_v28 = vadd.f32 %v2540_v58, %v1313_v25 }
 0x3d3   : > { %v1394_v41 = vmul.f32 %v1378_v28, %v2494_v61 }
 0x3d5   : > { %v1410_v31 = vmax.f32 %v1394_v41, 0.0 }
 0x3d7   : > { %v2017_v33 = vpack.c.bf16 %v1410_v31, %v1409_v30 }
 0x3d8   : > { %v1316_v34 = vpop.f32.mrf.mxu3 }
 0x3d9   : > { %2062 = vst [vmem:[%s2549_s16 + $0x18] sm:$0xff] %v2017_v33   ;;  %v1379_v48 = vadd.f32 %v2540_v58, %v1316_v34 }
 0x3db   : > { %v1395_v37 = vmul.f32 %v1379_v48, %v2498_v10 }
 0x3dd   : > { %v1411_v39 = vmax.f32 %v1395_v37, 0.0 }
 0x3e0   : > { %v1318_v35 = vpop.f32.mrf.mxu3 }
 0x3e1   : > { %v1380_v38 = vadd.f32 %v2540_v58, %v1318_v35 }
 0x3e3   : > { %v1396_v55 = vmul.f32 %v1380_v38, %v2502_v16 }
 0x3e5   : > { %v1412_v42 = vmax.f32 %v1396_v55, 0.0 }
 0x3e7   : > { %v2022_v43 = vpack.c.bf16 %v1412_v42, %v1411_v39 }
 0x3e8   : > { %v1321_v44 = vpop.f32.mrf.mxu3 }
 0x3e9   : > { %2063 = vst [vmem:[%s2549_s16 + $0x20] sm:$0xff] %v2022_v43   ;;  %v1381_v61 = vadd.f32 %v2540_v58, %v1321_v44 }
 0x3eb   : > { %v1397_v47 = vmul.f32 %v1381_v61, %v2506_v26 }
 0x3ed   : > { %v1413_v50 = vmax.f32 %v1397_v47, 0.0 }
 0x3f0   : > { %v1323_v45 = vpop.f32.mrf.mxu3 }
 0x3f1   : > { %v1382_v49 = vadd.f32 %v2540_v58, %v1323_v45 }
 0x3f3   : > { %v1398_v10 = vmul.f32 %v1382_v49, %v2510_v32 }
 0x3f5   : > { %v1414_v51 = vmax.f32 %v1398_v10, 0.0 }
 0x3f7   : > { %v2027_v52 = vpack.c.bf16 %v1414_v51, %v1413_v50 }
 0x3f8   : > { %v1326_v16 = vpop.f32.mrf.mxu3 }
 0x3f9   : > { %2064 = vst [vmem:[%s2549_s16 + $0x28] sm:$0xff] %v2027_v52   ;;  %v1383_v53 = vadd.f32 %v2540_v58, %v1326_v16 }
 0x3fb   : > { %v1399_v57 = vmul.f32 %v1383_v53, %v2514_v40 }
 0x3fd   : > { %v1415_v63 = vmax.f32 %v1399_v57, 0.0 }
 0x400   : > { %v1328_v56 = vpop.f32.mrf.mxu3 }
 0x401   : > { %v1384_v60 = vadd.f32 %v2540_v58, %v1328_v56 }
 0x403   : > { %v1400_v26 = vmul.f32 %v1384_v60, %v2518_v46 }
 0x405   : > { %v1416_v2 = vmax.f32 %v1400_v26, 0.0 }
 0x407   : > { %v2032_v4 = vpack.c.bf16 %v1416_v2, %v1415_v63 }
 0x408   : > { %v1331_v32 = vpop.f32.mrf.mxu3 }
 0x409   : > { %2065 = vst [vmem:[%s2549_s16 + $0x30] sm:$0xff] %v2032_v4   ;;  %v1385_v5 = vadd.f32 %v2540_v58, %v1331_v32 }
 0x40b   : > { %v1401_v40 = vmul.f32 %v1385_v5, %v2522_v54 }
 0x40d   : > { %v1417_v14 = vmax.f32 %v1401_v40, 0.0 }
 0x410   : > { %v1333_v6 = vpop.f32.mrf.mxu3 }
 0x411   : > { %v1386_v46 = vadd.f32 %v2540_v58, %v1333_v6 }
 0x413   : > { %v1402_v9 = vmul.f32 %v1386_v46, %v2526_v62 }
 0x415   : > { %v1418_v59 = vmax.f32 %v1402_v9, 0.0 }
 0x417   : > { %v2037_v0 = vpack.c.bf16 %v1418_v59, %v1417_v14 }
 0x419   : > { %2066 = vst [vmem:[%s2549_s16 + $0x38] sm:$0xff] %v2037_v0  }
 0x41a   : > { %2224 = shalt.err (!%p2221_p8)
}
 0x41b   : > { %s2274_s14 = smov 64   ;;  %s2275_s16 = smov 4  }
 0x41c   : > { %2075 = dma.vmem_to_hbm [thread:$0]  (%p2354_p5), %s1465_s21, 1024, %s1467_s22, %s1452_s28, %s2274_s14, %s2274_s14, %s2275_s16  }
 0x41d PF: > { %p2092_p9 = scmp.ge.s32.totalorder %s2267_s27, 2  ;;  %s1481_s18 = sand.u32 1, %s2255_s24  }
 0x41e   : > { %s1482_s19 = scalar_lea.sflag [#allocation6], %s1481_s18 }
 0x41f   : > { %p2085_p10 = pnand %p2092_p9, %p2358_p6 }
 0x421   : > { %p2086_p11 = pneg %p2085_p10 }
 0x423   : > { %2250 = dma.done.wait (%p2086_p11), %s1482_s19, 1024  }
 0x424   : > { %2252 = vsyncadd (%p2086_p11), %s1482_s19, 4294966272  ;;  %p19_p12 = scmp.ge.s32.totalorder %s2341_s30, 4   ;;  %s2632_s24 = smov %s2259_s25 }
 0x425   : > { %s2633_s25 = smov %s2263_s26  ;;  %s2634_s26 = smov %s2352_s10 }
 0x426   : > { %s2635_s27 = smov %s2341_s30  ;;  %21 = sbr.rel (!%p19_p12) target bundleno = 5 (0x5), region = 98 }
 0x42b   :  { %1488 = vsyncpa [#allocation5], 1 }
 0x42c   :  { %1490 = vsyncpa [#allocation5 + $0x1], 1 }
 0x42d   :  { %1491 = vsyncpa [#allocation8], 1 }
 0x42e   :  { %1492 = vsyncpa [#allocation6], 1 }
 0x42f   :  { %1494 = vsyncpa [#allocation6 + $0x1], 1 }

// kernel: tpu_custom_call.1
= control target key start
LH: loop header
LB: loop body
LE: loop exit
PB: predicated region body
PF: predicated region fallthrough
CT: control target
= control target key end

     0   :  { %12 = vsyncpa [#allocation5], 0  ;;  %s2621_s0 = inlined_call_operand.vmem [shape: bf16[2,128,128], index: 0, kind: input, shape index: {}]   ;;  %s2622_s1 = inlined_call_operand.vmem [shape: bf16[2,128,128], index: 1, kind: input, shape index: {}]   ;;  %s2623_s2 = inlined_call_operand.vmem [shape: f32[2,128,1], index: 2, kind: input, shape index: {}]   ;;  %s2624_s3 = inlined_call_operand.hbm [shape: bf16[128,128], index: 3, kind: input, shape index: {}]   ;;  %s2625_s4 = inlined_call_operand.hbm [shape: bf16[128,128], index: 4, kind: input, shape index: {}]   ;;  %s2626_s5 = inlined_call_operand.vmem [shape: f32[1,128], index: 5, kind: input, shape index: {}]   ;;  %s2627_s6 = inlined_call_operand.vmem [shape: f32[1,128], index: 6, kind: input, shape index: {}]   ;;  %s2628_s7 = inlined_call_operand.hbm [shape: bf16[2,128,128], index: 7, kind: output, shape index: {}]  }
   0x1   :  { %13 = vsyncpa [#allocation8], 0 }
   0x2   :  { %14 = vsyncpa [#allocation6], 0 }
   0x3   :  { %16 = vsyncpa [#allocation6 + $0x1], 0  ;;  %s2316_s24 = smov 0   ;;  %s2318_s25 = smov 0  }
   0x4   :  { %s2320_s26 = smov 0   ;;  %s2322_s27 = smov 0  }
   0x5 LB: > { %s2337_s28 = sadd.s32 4294967295, %s2267_s27   ;;  %s1575_s29 = sadd.s32 4294967294, %s2267_s27   ;;  %s2267_s27 = sphi %s2322_s27, %s2635_s27   ;;  %s2263_s26 = sphi %s2320_s26, %s2634_s26   ;;  %s2259_s25 = sphi %s2318_s25, %s2633_s25   ;;  %s2255_s24 = sphi %s2316_s24, %s2632_s24  }
   0x6   : > { %s2341_s30 = sadd.s32 1, %s2267_s27   ;;  %s191_s8 = sadd.s32 1, %s2263_s26 }
   0x7   : > { %s188_s9 = ssub.s32 %s2267_s27, %s2341_s30  ;;  %p201_p0 = scmp.ne.s32.totalorder %s2263_s26, %s2259_s25 }
   0x8   : > { %p189_p1 = scmp.eq.s32.totalorder %s188_s9, 0  ;;  %p202_p2 = scmp.eq.s32.totalorder %s2337_s28, 1 }
   0x9   : > { %p207_p3 = scmp.ne.s32.totalorder %s2259_s25, %s2255_s24  ;;  %p208_p4 = scmp.eq.s32.totalorder %s1575_s29, 1 }
   0xa   : > { %s2352_s10 = scalar_select %p189_p1, %s2263_s26, %s191_s8  }
   0xb   : > { %p2354_p5 = por %p202_p2, %p201_p0  ;;  %p2358_p6 = por %p208_p4, %p207_p3 }
   0xc   : > { %p1576_p7 = scmp.ge.s32.totalorder %s2267_s27, 1  ;;  %p215_p8 = scmp.lt.s32.totalorder %s2267_s27, 3 }
   0xd   : > { %p2088_p9 = scmp.eq.s32.totalorder %s2337_s28, 0  ;;  %s226_s16 = sshll.u32 %s2624_s3, 4  ;;  %s227_s16 = int_to_ptr.hbm [resolvable:$true] %s226_s16 }
   0xe   : > { %p2365_p10 = pnand %p1576_p7, %p215_p8  ;;  %s2269_s17 = smov [#allocation4]  }
   0xf   : > { %s228_s18 = sshll.u32 %s2269_s17, 4  ;;  %s240_s21 = sshll.u32 %s2625_s4, 4  ;;  %s229_s18 = int_to_ptr.vmem [resolvable:$true] %s228_s18  ;;  %s241_s21 = int_to_ptr.hbm [resolvable:$true] %s240_s21 }
  0x10   : > { %p2077_p11 = pneg %p2365_p10  ;;  %s2270_s22 = smov 64  }
  0x11   : > { %s2271_s23 = smov 4   ;;  %s2272_s29 = smov [#allocation7]  }
  0x12   : > { %p2078_p12 = pnand %p2088_p9, %p2077_p11  ;;  %s242_s8 = sshll.u32 %s2272_s29, 4  ;;  %s243_s8 = int_to_ptr.vmem [resolvable:$true] %s242_s8 }
  0x13   : > { %288 = sbr.rel (%p2365_p10) target bundleno = 1053 (0x41d), region = 48 }
  0x14   : > { %2080 = dma.hbm_to_vmem [thread:$0]  (!%p2078_p12), %s227_s16, 1024, %s229_s18, [#allocation5], %s2270_s22, %s2270_s22, %s2271_s23  }
  0x15   : > { %2083 = dma.hbm_to_vmem [thread:$0]  (!%p2078_p12), %s241_s21, 1024, %s243_s8, [#allocation8], %s2270_s22, %s2270_s22, %s2271_s23  }
  0x18   : > { %2242 = dma.done.wait (%p2088_p9), [#allocation5], 1024  }
  0x19   : > { %2244 = vsyncadd (%p2088_p9), [#allocation5], 4294966272 }
  0x1a   : > { %2246 = dma.done.wait (%p2088_p9), [#allocation8], 1024  }
  0x1b   : > { %2248 = vsyncadd (%p2088_p9), [#allocation8], 4294966272  ;;  %v1845_v0 = vld [vmem:[#allocation4 + $0x38] sm:$0xff]  ;;  %v1844_v1 = vld [vmem:[#allocation4 + $0x30] sm:$0xff]  ;;  %p336_p13 = scmp.lt.s32.totalorder %s2337_s28, 1  ;;  %v2273_v35 = vmov 0  }
  0x1c   : > { %512 = vmatpush.bf16.msra.mxu0 %v1845_v0  ;;  %v1843_v2 = vld [vmem:[#allocation4 + $0x28] sm:$0xff]  ;;  %v1842_v3 = vld [vmem:[#allocation4 + $0x20] sm:$0xff]  ;;  %v1841_v4 = vld [vmem:[#allocation4 + $0x18] sm:$0xff]  ;;  %2132 = vset.pattern.permute.xlu0 %v2273_v35  ;;  %s333_s14 = sand.u32 1, %s2259_s25  }
  0x1d   : > { %v1840_v5 = vld [vmem:[#allocation4 + $0x10] sm:$0xff]  ;;  %s2391_s9 = scalar_select %p336_p13, %s2337_s28, 1  ;;  %v1839_v6 = vld [vmem:[#allocation4 + $0x8] sm:$0xff]  ;;  %v1838_v7 = vld [vmem:[#allocation4] sm:$0xff]  ;;  %2133 = vset.pattern.permute.xlu1 %v2273_v35  ;;  %2134 = vset.pattern.permute.xlu2 %v2273_v35 }
  0x1e   : > { %s1583_s15 = sshll.u32 %s333_s14, 6 }
  0x1f   : > { %s1819_s13 = sshll.u32 %s2391_s9, 6  ;;  %s1821_s17 = sshll.u32 %s2391_s9, 7 }
  0x20   : > { %513 = vmatpush.bf16.msra.mxu0 %v1844_v1  ;;  %s345_s16 = scalar_lea.vmem %s2622_s1, %s1819_s13  ;;  %s2403_s20 = scalar_lea.vmem %s2623_s2, %s1821_s17 }
  0x21   : > { %v1830_v8 = vld [vmem:[%s345_s16] sm:$0xff]  ;;  %v1831_v9 = vld [vmem:[%s345_s16 + $0x8] sm:$0xff]  ;;  %v1832_v10 = vld [vmem:[%s345_s16 + $0x10] sm:$0xff]  ;;  %s2420_s23 = scalar_lea.vmem %s2621_s0, %s1819_s13  ;;  %s1878_s17 = sshll.u32 %s2337_s28, 6 }
  0x22   : > { %v1833_v11 = vld [vmem:[%s345_s16 + $0x18] sm:$0xff]  ;;  %v1834_v12 = vld [vmem:[%s345_s16 + $0x20] sm:$0xff]  ;;  %v1835_v13 = vld [vmem:[%s345_s16 + $0x28] sm:$0xff]  ;;  %s1452_s28 = scalar_lea.sflag [#allocation6], %s333_s14  ;;  %s2217_s13 = scalar_lea.hbm %s2628_s7, 128 }
  0x23   : > { %v1836_v14 = vld [vmem:[%s345_s16 + $0x30] sm:$0xff]  ;;  %v1837_v15 = vld [vmem:[%s345_s16 + $0x38] sm:$0xff]  ;;  %v367_v36 = vld [vmem:[%s2403_s20] sm:$0xff]  ;;  %s2549_s16 = scalar_lea.vmem [#allocation9], %s1583_s15 }
  0x24   : > { %514 = vmatpush.bf16.msra.mxu0 %v1843_v2  ;;  %839 = vperm.xlu0 %2132, %v367_v36   ;;  %v368_v39 = vld [vmem:[%s2403_s20 + $0x8] sm:$0xff]  ;;  %v373_v41 = vld [vmem:[%s2403_s20 + $0x30] sm:$0xff]  ;;  %v370_v47 = vld [vmem:[%s2403_s20 + $0x18] sm:$0xff]  ;;  %s1464_s21 = sshll.u32 %s2549_s16, 4  ;;  %s1465_s21 = int_to_ptr.vmem [resolvable:$true] %s1464_s21 }
  0x25   : > { %v369_v44 = vld [vmem:[%s2403_s20 + $0x10] sm:$0xff]  ;;  %v376_v45 = vld [vmem:[%s2403_s20 + $0x48] sm:$0xff]  ;;  %v379_v49 = vld [vmem:[%s2403_s20 + $0x60] sm:$0xff] }
  0x26   : > { %849 = vperm.xlu1 %2133, %v369_v44   ;;  %v374_v51 = vld [vmem:[%s2403_s20 + $0x38] sm:$0xff]  ;;  %v377_v55 = vld [vmem:[%s2403_s20 + $0x50] sm:$0xff]  ;;  %v380_v58 = vld [vmem:[%s2403_s20 + $0x68] sm:$0xff] }
  0x27   : > { %v382_v53 = vld [vmem:[%s2403_s20 + $0x78] sm:$0xff]  ;;  %v2424_v60 = vld [vmem:[%s2420_s23] sm:$0xff]  ;;  %v372_v62 = vld [vmem:[%s2403_s20 + $0x28] sm:$0xff] }
  0x28   : > { %515 = vmatpush.bf16.msra.mxu0 %v1842_v3  ;;  %v371_v61 = vld [vmem:[%s2403_s20 + $0x20] sm:$0xff]  ;;  %v2430_v63 = vld [vmem:[%s2420_s23 + $0x8] sm:$0xff]  ;;  %v378_v1 = vld [vmem:[%s2403_s20 + $0x58] sm:$0xff] }
  0x29   : > { %859 = vperm.xlu2 %2134, %v371_v61   ;;  %v375_v0 = vld [vmem:[%s2403_s20 + $0x40] sm:$0xff]  ;;  %v2436_v2 = vld [vmem:[%s2420_s23 + $0x10] sm:$0xff] }
  0x2a   : > { %v381_v3 = vld [vmem:[%s2403_s20 + $0x70] sm:$0xff]  ;;  %s1463_s20 = scalar_lea.hbm %s2628_s7, %s1878_s17 }
  0x2b   : > { %s1466_s22 = sshll.u32 %s1463_s20, 4  ;;  %s1467_s22 = int_to_ptr.hbm [resolvable:$true] %s1466_s22 }
  0x2c   : > { %516 = vmatpush.bf16.msra.mxu0 %v1841_v4  ;;  %844 = vperm.xlu0 %2132, %v368_v39   ;;  %v2441_v4 = vld [vmem:[%s2420_s23 + $0x18] sm:$0xff] }
  0x2e   : > { %854 = vperm.xlu1 %2133, %v370_v47  }
  0x30   : > { %517 = vmatpush.bf16.msra.mxu0 %v1840_v5  ;;  %v2445_v5 = vld [vmem:[%s2420_s23 + $0x20] sm:$0xff] }
  0x31   : > { %864 = vperm.xlu2 %2134, %v372_v62  }
  0x34   : > { %518 = vmatpush.bf16.msra.mxu0 %v1839_v6  ;;  %869 = vperm.xlu0 %2132, %v373_v41   ;;  %v2449_v6 = vld [vmem:[%s2420_s23 + $0x28] sm:$0xff] }
  0x36   : > { %874 = vperm.xlu1 %2133, %v374_v51  }
  0x38   : > { %519 = vmatpush.bf16.msra.mxu0 %v1838_v7  ;;  %v1869_v7 = vld [vmem:[#allocation7 + $0x38] sm:$0xff] }
  0x39   : > { %879 = vperm.xlu2 %2134, %v375_v0   ;;  %1110 = vmatpush.bf16.msra.mxu2 %v1869_v7 }
  0x3b   : > { %520 = vmatmul.bf16.vlgmr.msra.gmra.mxu0 %v1830_v8  ;;  %v1868_v8 = vld [vmem:[#allocation7 + $0x30] sm:$0xff] }
  0x3c   : > { %884 = vperm.xlu0 %2132, %v376_v45  }
  0x3d   : > { %1111 = vmatpush.bf16.msra.mxu2 %v1868_v8 }
  0x3e   : > { %889 = vperm.xlu1 %2133, %v377_v55  }
  0x41   : > { %894 = vperm.xlu2 %2134, %v378_v1  }
  0x44   : > { %899 = vperm.xlu0 %2132, %v379_v49  }
  0x46   : > { %904 = vperm.xlu1 %2133, %v380_v58  }
  0x49   : > { %909 = vperm.xlu2 %2134, %v381_v3  }
  0x4b   : > { %525 = vmatmul.bf16.gmra.mxu0 %v1831_v9  ;;  %v2453_v9 = vld [vmem:[%s2420_s23 + $0x30] sm:$0xff] }
  0x4c   : > { %914 = vperm.xlu0 %2132, %v382_v53  }
  0x5b   : > { %530 = vmatmul.bf16.gmra.mxu0 %v1832_v10  ;;  %v1867_v10 = vld [vmem:[#allocation7 + $0x28] sm:$0xff] }
  0x5c   : > { %1112 = vmatpush.bf16.msra.mxu2 %v1867_v10 }
  0x6b   : > { %535 = vmatmul.bf16.gmra.mxu0 %v1833_v11  ;;  %v1866_v11 = vld [vmem:[#allocation7 + $0x20] sm:$0xff] }
  0x6c   : > { %1113 = vmatpush.bf16.msra.mxu2 %v1866_v11 }
  0x7b   : > { %540 = vmatmul.bf16.gmra.mxu0 %v1834_v12  ;;  %v1865_v12 = vld [vmem:[#allocation7 + $0x18] sm:$0xff] }
  0x7c   : > { %1114 = vmatpush.bf16.msra.mxu2 %v1865_v12 }
  0x83   : > { %v2481_v41 = vpop.permute.xlu2 %859 }
  0x8b   : > { %545 = vmatmul.bf16.gmra.mxu0 %v1835_v13  ;;  %v1864_v13 = vld [vmem:[#allocation7 + $0x10] sm:$0xff] }
  0x8c   : > { %1115 = vmatpush.bf16.msra.mxu2 %v1864_v13 }
  0x9b   : > { %550 = vmatmul.bf16.gmra.mxu0 %v1836_v14  ;;  %v2457_v14 = vld [vmem:[%s2420_s23 + $0x38] sm:$0xff]  ;;  %s2211_s23 = sshra.s32 %s1467_s22, 4  ;;  %s2212_s23 = int_to_ptr.hbm [resolvable:$true] %s2211_s23 }
  0x9c   : > { %s2213_s29 = scalar_lea.hbm %s2212_s23, 64  ;;  %p2218_p3 = scmp.lt.s32.totalorder %s2212_s23, %s2628_s7 }
  0x9d   : > { %p2214_p0 = scmp.ne.s32.totalorder %s2212_s23, %s2213_s29  ;;  %p2219_p4 = scmp.lt.s32.totalorder %s2217_s13, %s2213_s29 }
  0x9f   : > { %p2215_p1 = pnand %p2214_p0, %p2354_p5  ;;  %p2220_p7 = por %p2219_p4, %p2218_p3 }
  0xa1   : > { %p2216_p2 = pneg %p2215_p1 }
  0xa3   : > { %p2221_p8 = pnand %p2220_p7, %p2216_p2 }
  0xab   : > { %555 = vmatmul.bf16.gmra.mxu0 %v1837_v15  ;;  %v1863_v15 = vld [vmem:[#allocation7 + $0x8] sm:$0xff] }
  0xac   : > { %1116 = vmatpush.bf16.msra.mxu2 %v1863_v15 }
  0xb8   : > { %v521_v16 = vpop.f32.mrf.mxu0 }
  0xc0   : > { %v523_v17 = vpop.f32.mrf.mxu0 }
  0xc1   : > { %v1882_v18 = vpack.c.bf16 %v523_v17, %v521_v16  ;;  %v1862_v16 = vld [vmem:[#allocation7] sm:$0xff]  ;;  %v2460_v17 = vpop.permute.xlu0 %839 }
  0xc2   : > { %1117 = vmatpush.bf16.msra.mxu2 %v1862_v16 }
  0xc3   : > { %1883 = vst [vmem:[#allocation3 + $0x30] sm:$0xff] %v1882_v18  }
  0xc8   : > { %v526_v19 = vpop.f32.mrf.mxu0 }
  0xca   : > { %v1846_v59 = vld [vmem:[#allocation3 + $0x30] sm:$0xff] }
  0xd0   : > { %v528_v20 = vpop.f32.mrf.mxu0 }
  0xd1   : > { %v1887_v21 = vpack.c.bf16 %v528_v20, %v526_v19  ;;  %v2465_v19 = vld [vmem:[%s2626_s5] ss:$0 sm:$0xff] }
  0xd3   : > { %2039 = vst [vmem:[#allocation3] sm:$0xff] %v1887_v21  }
  0xd8   : > { %v531_v22 = vpop.f32.mrf.mxu0 }
  0xda   : > { %v1847_v57 = vld [vmem:[#allocation3] sm:$0xff] }
  0xe0   : > { %v533_v23 = vpop.f32.mrf.mxu0 }
  0xe1   : > { %v1892_v24 = vpack.c.bf16 %v533_v23, %v531_v22 }
  0xe3   : > { %2040 = vst [vmem:[#allocation3 + $0x18] sm:$0xff] %v1892_v24   ;;  %v2470_v24 = vpop.permute.xlu0 %844 }
  0xe8   : > { %v536_v25 = vpop.f32.mrf.mxu0 }
  0xea   : > { %v1848_v56 = vld [vmem:[#allocation3 + $0x18] sm:$0xff] }
  0xeb   : > { %v2490_v55 = vpop.permute.xlu0 %869 }
  0xf0   : > { %v538_v26 = vpop.f32.mrf.mxu0 }
  0xf1   : > { %v1897_v27 = vpack.c.bf16 %v538_v26, %v536_v25 }
  0xf3   : > { %2041 = vst [vmem:[#allocation3 + $0x10] sm:$0xff] %v1897_v27   ;;  %v2502_v16 = vpop.permute.xlu0 %884 }
  0xf8   : > { %v541_v28 = vpop.f32.mrf.mxu0 }
  0xfa   : > { %v1849_v54 = vld [vmem:[#allocation3 + $0x10] sm:$0xff] }
 0x100   : > { %v543_v29 = vpop.f32.mrf.mxu0 }
 0x101   : > { %v1902_v30 = vpack.c.bf16 %v543_v29, %v541_v28  ;;  %v2473_v29 = vpop.permute.xlu1 %849 }
 0x103   : > { %2042 = vst [vmem:[#allocation3 + $0x8] sm:$0xff] %v1902_v30  }
 0x108   : > { %v546_v31 = vpop.f32.mrf.mxu0 }
 0x109   : > { %v2478_v36 = vpop.permute.xlu1 %854 }
 0x10a   : > { %v1850_v52 = vld [vmem:[#allocation3 + $0x8] sm:$0xff] }
 0x110   : > { %v548_v32 = vpop.f32.mrf.mxu0 }
 0x111   : > { %v1907_v33 = vpack.c.bf16 %v548_v32, %v546_v31  ;;  %v2494_v61 = vpop.permute.xlu1 %874 }
 0x113   : > { %2043 = vst [vmem:[#allocation3 + $0x20] sm:$0xff] %v1907_v33  }
 0x118   : > { %v551_v34 = vpop.f32.mrf.mxu0 }
 0x11a   : > { %v1851_v50 = vld [vmem:[#allocation3 + $0x20] sm:$0xff] }
 0x120   : > { %v553_v37 = vpop.f32.mrf.mxu0 }
 0x121   : > { %v1912_v38 = vpack.c.bf16 %v553_v37, %v551_v34 }
 0x123   : > { %2044 = vst [vmem:[#allocation3 + $0x28] sm:$0xff] %v1912_v38  }
 0x128   : > { %v556_v40 = vpop.f32.mrf.mxu0 }
 0x12a   : > { %v1852_v48 = vld [vmem:[#allocation3 + $0x28] sm:$0xff] }
 0x130   : > { %v558_v42 = vpop.f32.mrf.mxu0 }
 0x131   : > { %v1917_v43 = vpack.c.bf16 %v558_v42, %v556_v40 }
 0x133   : > { %2045 = vst [vmem:[#allocation3 + $0x38] sm:$0xff] %v1917_v43  }
 0x13a   : > { %v1853_v46 = vld [vmem:[#allocation3 + $0x38] sm:$0xff] }
 0x13b   : > { %737 = vmatpush.bf16.msra.mxu1 %v1853_v46 }
 0x13f   : > { %738 = vmatpush.bf16.msra.mxu1 %v1852_v48  ;;  %v2486_v48 = vpop.permute.xlu2 %864 }
 0x143   : > { %739 = vmatpush.bf16.msra.mxu1 %v1851_v50 }
 0x147   : > { %740 = vmatpush.bf16.msra.mxu1 %v1850_v52  ;;  %v2498_v10 = vpop.permute.xlu2 %879 }
 0x14b   : > { %741 = vmatpush.bf16.msra.mxu1 %v1849_v54 }
 0x14f   : > { %742 = vmatpush.bf16.msra.mxu1 %v1848_v56 }
 0x153   : > { %743 = vmatpush.bf16.msra.mxu1 %v1847_v57 }
 0x157   : > { %744 = vmatpush.bf16.msra.mxu1 %v1846_v59 }
 0x15a   : > { %745 = vmatmul.bf16.vlgmr.msra.gmra.mxu1 %v2424_v60 }
 0x16a   : > { %750 = vmatmul.bf16.gmra.mxu1 %v2430_v63 }
 0x17a   : > { %755 = vmatmul.bf16.gmra.mxu1 %v2436_v2 }
 0x18a   : > { %760 = vmatmul.bf16.gmra.mxu1 %v2441_v4 }
 0x19a   : > { %765 = vmatmul.bf16.gmra.mxu1 %v2445_v5 }
 0x1aa   : > { %770 = vmatmul.bf16.gmra.mxu1 %v2449_v6 }
 0x1ba   : > { %775 = vmatmul.bf16.gmra.mxu1 %v2453_v9 }
 0x1ca   : > { %780 = vmatmul.bf16.gmra.mxu1 %v2457_v14 }
 0x1d7   : > { %v746_v18 = vpop.f32.mrf.mxu1 }
 0x1d8   : > { %v821_v20 = vadd.f32 %v2465_v19, %v746_v18 }
 0x1da   : > { %v917_v22 = vmul.f32 %v2460_v17, %v821_v20 }
 0x1dc   : > { %v933_v26 = vmax.f32 %v917_v22, 0.0 }
 0x1df   : > { %v748_v21 = vpop.f32.mrf.mxu1 }
 0x1e0   : > { %v822_v23 = vadd.f32 %v2465_v19, %v748_v21 }
 0x1e2   : > { %v918_v25 = vmul.f32 %v2470_v24, %v822_v23 }
 0x1e4   : > { %v934_v27 = vmax.f32 %v918_v25, 0.0 }
 0x1e6   : > { %v1922_v28 = vpack.c.bf16 %v934_v27, %v933_v26  ;;  %v2506_v26 = vpop.permute.xlu1 %889 }
 0x1e7   : > { %v751_v30 = vpop.f32.mrf.mxu1 }
 0x1e8   : > { %1923 = vst [vmem:[#allocation3 + $0x30] sm:$0xff] %v1922_v28   ;;  %v823_v31 = vadd.f32 %v2465_v19, %v751_v30 }
 0x1ea   : > { %v919_v34 = vmul.f32 %v2473_v29, %v823_v31 }
 0x1ec   : > { %v935_v38 = vmax.f32 %v919_v34, 0.0 }
 0x1ef   : > { %v753_v32 = vpop.f32.mrf.mxu1  ;;  %v1854_v33 = vld [vmem:[#allocation3 + $0x30] sm:$0xff] }
 0x1f0   : > { %v824_v35 = vadd.f32 %v2465_v19, %v753_v32  ;;  %1118 = vmatmul.bf16.vlgmr.msra.gmra.mxu2 %v1854_v33  ;;  %v2510_v32 = vpop.permute.xlu2 %894 }
 0x1f2   : > { %v920_v37 = vmul.f32 %v2478_v36, %v824_v35 }
 0x1f4   : > { %v936_v39 = vmax.f32 %v920_v37, 0.0 }
 0x1f6   : > { %v1927_v40 = vpack.c.bf16 %v936_v39, %v935_v38 }
 0x1f7   : > { %v756_v42 = vpop.f32.mrf.mxu1 }
 0x1f8   : > { %2046 = vst [vmem:[#allocation3] sm:$0xff] %v1927_v40   ;;  %v825_v43 = vadd.f32 %v2465_v19, %v756_v42  ;;  %v2514_v40 = vpop.permute.xlu0 %899 }
 0x1fa   : > { %v921_v46 = vmul.f32 %v2481_v41, %v825_v43 }
 0x1fc   : > { %v937_v50 = vmax.f32 %v921_v46, 0.0  ;;  %v2518_v46 = vpop.permute.xlu1 %904 }
 0x1ff   : > { %v758_v44 = vpop.f32.mrf.mxu1  ;;  %v1855_v45 = vld [vmem:[#allocation3] sm:$0xff] }
 0x200   : > { %v826_v47 = vadd.f32 %v2465_v19, %v758_v44  ;;  %1123 = vmatmul.bf16.gmra.mxu2 %v1855_v45 }
 0x202   : > { %v922_v49 = vmul.f32 %v2486_v48, %v826_v47 }
 0x204   : > { %v938_v51 = vmax.f32 %v922_v49, 0.0 }
 0x206   : > { %v1932_v52 = vpack.c.bf16 %v938_v51, %v937_v50 }
 0x207   : > { %v761_v53 = vpop.f32.mrf.mxu1 }
 0x208   : > { %2047 = vst [vmem:[#allocation3 + $0x18] sm:$0xff] %v1932_v52   ;;  %v827_v54 = vadd.f32 %v2465_v19, %v761_v53 }
 0x20a   : > { %v923_v58 = vmul.f32 %v2490_v55, %v827_v54  ;;  %v2522_v54 = vpop.permute.xlu2 %909 }
 0x20c   : > { %v939_v0 = vmax.f32 %v923_v58, 0.0 }
 0x20f   : > { %v763_v56 = vpop.f32.mrf.mxu1  ;;  %v1856_v57 = vld [vmem:[#allocation3 + $0x18] sm:$0xff] }
 0x210   : > { %v828_v59 = vadd.f32 %v2465_v19, %v763_v56  ;;  %1128 = vmatmul.bf16.gmra.mxu2 %v1856_v57 }
 0x212   : > { %v924_v62 = vmul.f32 %v2494_v61, %v828_v59 }
 0x214   : > { %v940_v1 = vmax.f32 %v924_v62, 0.0  ;;  %v2526_v62 = vpop.permute.xlu0 %914 }
 0x216   : > { %v1937_v3 = vpack.c.bf16 %v940_v1, %v939_v0 }
 0x217   : > { %v766_v7 = vpop.f32.mrf.mxu1 }
 0x218   : > { %2048 = vst [vmem:[#allocation3 + $0x10] sm:$0xff] %v1937_v3   ;;  %v829_v8 = vadd.f32 %v2465_v19, %v766_v7 }
 0x21a   : > { %v925_v13 = vmul.f32 %v2498_v10, %v829_v8 }
 0x21c   : > { %v941_v20 = vmax.f32 %v925_v13, 0.0 }
 0x21f   : > { %v768_v11 = vpop.f32.mrf.mxu1  ;;  %v1857_v12 = vld [vmem:[#allocation3 + $0x10] sm:$0xff] }
 0x220   : > { %v830_v15 = vadd.f32 %v2465_v19, %v768_v11  ;;  %1133 = vmatmul.bf16.gmra.mxu2 %v1857_v12 }
 0x222   : > { %v926_v18 = vmul.f32 %v2502_v16, %v830_v15 }
 0x224   : > { %v942_v21 = vmax.f32 %v926_v18, 0.0 }
 0x226   : > { %v1942_v22 = vpack.c.bf16 %v942_v21, %v941_v20 }
 0x227   : > { %v771_v23 = vpop.f32.mrf.mxu1 }
 0x228   : > { %2049 = vst [vmem:[#allocation3 + $0x8] sm:$0xff] %v1942_v22   ;;  %v831_v25 = vadd.f32 %v2465_v19, %v771_v23 }
 0x22a   : > { %v927_v30 = vmul.f32 %v2506_v26, %v831_v25 }
 0x22c   : > { %v943_v34 = vmax.f32 %v927_v30, 0.0 }
 0x22f   : > { %v773_v27 = vpop.f32.mrf.mxu1  ;;  %v1858_v28 = vld [vmem:[#allocation3 + $0x8] sm:$0xff] }
 0x230   : > { %v832_v31 = vadd.f32 %v2465_v19, %v773_v27  ;;  %1138 = vmatmul.bf16.gmra.mxu2 %v1858_v28 }
 0x232   : > { %v928_v33 = vmul.f32 %v2510_v32, %v832_v31 }
 0x234   : > { %v944_v35 = vmax.f32 %v928_v33, 0.0 }
 0x236   : > { %v1947_v37 = vpack.c.bf16 %v944_v35, %v943_v34 }
 0x237   : > { %v776_v38 = vpop.f32.mrf.mxu1 }
 0x238   : > { %2050 = vst [vmem:[#allocation3 + $0x20] sm:$0xff] %v1947_v37   ;;  %v833_v39 = vadd.f32 %v2465_v19, %v776_v38 }
 0x23a   : > { %v929_v44 = vmul.f32 %v2514_v40, %v833_v39 }
 0x23c   : > { %v945_v49 = vmax.f32 %v929_v44, 0.0 }
 0x23f   : > { %v778_v42 = vpop.f32.mrf.mxu1  ;;  %v1859_v43 = vld [vmem:[#allocation3 + $0x20] sm:$0xff] }
 0x240   : > { %v834_v45 = vadd.f32 %v2465_v19, %v778_v42  ;;  %1143 = vmatmul.bf16.gmra.mxu2 %v1859_v43 }
 0x242   : > { %v930_v47 = vmul.f32 %v2518_v46, %v834_v45 }
 0x244   : > { %v946_v50 = vmax.f32 %v930_v47, 0.0 }
 0x246   : > { %v1952_v51 = vpack.c.bf16 %v946_v50, %v945_v49 }
 0x247   : > { %v781_v52 = vpop.f32.mrf.mxu1 }
 0x248   : > { %2051 = vst [vmem:[#allocation3 + $0x28] sm:$0xff] %v1952_v51   ;;  %v835_v53 = vadd.f32 %v2465_v19, %v781_v52 }
 0x24a   : > { %v931_v58 = vmul.f32 %v2522_v54, %v835_v53 }
 0x24c   : > { %v947_v1 = vmax.f32 %v931_v58, 0.0  ;;  %v2540_v58 = vld [vmem:[%s2627_s6] ss:$0 sm:$0xff] }
 0x24f   : > { %v783_v56 = vpop.f32.mrf.mxu1  ;;  %v1860_v57 = vld [vmem:[#allocation3 + $0x28] sm:$0xff] }
 0x250   : > { %v836_v59 = vadd.f32 %v2465_v19, %v783_v56  ;;  %1148 = vmatmul.bf16.gmra.mxu2 %v1860_v57 }
 0x252   : > { %v932_v0 = vmul.f32 %v2526_v62, %v836_v59 }
 0x254   : > { %v948_v3 = vmax.f32 %v932_v0, 0.0 }
 0x256   : > { %v1957_v7 = vpack.c.bf16 %v948_v3, %v947_v1 }
 0x258   : > { %2052 = vst [vmem:[#allocation3 + $0x38] sm:$0xff] %v1957_v7  }
 0x25f   : > { %v1861_v8 = vld [vmem:[#allocation3 + $0x38] sm:$0xff] }
 0x260   : > { %1153 = vmatmul.bf16.gmra.mxu2 %v1861_v8 }
 0x273   : > { %v1119_v11 = vpop.f32.mrf.mxu2 }
 0x27b   : > { %v1121_v12 = vpop.f32.mrf.mxu2 }
 0x27c   : > { %v1962_v13 = vpack.c.bf16 %v1121_v12, %v1119_v11 }
 0x27e   : > { %1963 = vst [vmem:[#allocation3 + $0x30] sm:$0xff] %v1962_v13  }
 0x283   : > { %v1124_v15 = vpop.f32.mrf.mxu2 }
 0x285   : > { %v1870_v56 = vld [vmem:[#allocation3 + $0x30] sm:$0xff] }
 0x28b   : > { %v1126_v18 = vpop.f32.mrf.mxu2 }
 0x28c   : > { %v1967_v20 = vpack.c.bf16 %v1126_v18, %v1124_v15 }
 0x28e   : > { %2053 = vst [vmem:[#allocation3] sm:$0xff] %v1967_v20  }
 0x293   : > { %v1129_v19 = vpop.f32.mrf.mxu2 }
 0x295   : > { %v1871_v53 = vld [vmem:[#allocation3] sm:$0xff] }
 0x29b   : > { %v1131_v21 = vpop.f32.mrf.mxu2 }
 0x29c   : > { %v1972_v22 = vpack.c.bf16 %v1131_v21, %v1129_v19 }
 0x29e   : > { %2054 = vst [vmem:[#allocation3 + $0x18] sm:$0xff] %v1972_v22  }
 0x2a3   : > { %v1134_v23 = vpop.f32.mrf.mxu2 }
 0x2a5   : > { %v1872_v52 = vld [vmem:[#allocation3 + $0x18] sm:$0xff] }
 0x2ab   : > { %v1136_v25 = vpop.f32.mrf.mxu2 }
 0x2ac   : > { %v1977_v27 = vpack.c.bf16 %v1136_v25, %v1134_v23 }
 0x2ae   : > { %2055 = vst [vmem:[#allocation3 + $0x10] sm:$0xff] %v1977_v27  }
 0x2b3   : > { %v1139_v28 = vpop.f32.mrf.mxu2 }
 0x2b5   : > { %v1873_v51 = vld [vmem:[#allocation3 + $0x10] sm:$0xff] }
 0x2bb   : > { %v1141_v30 = vpop.f32.mrf.mxu2 }
 0x2bc   : > { %v1982_v31 = vpack.c.bf16 %v1141_v30, %v1139_v28 }
 0x2be   : > { %2056 = vst [vmem:[#allocation3 + $0x8] sm:$0xff] %v1982_v31  }
 0x2c3   : > { %v1144_v33 = vpop.f32.mrf.mxu2 }
 0x2c5   : > { %v1874_v50 = vld [vmem:[#allocation3 + $0x8] sm:$0xff] }
 0x2cb   : > { %v1146_v34 = vpop.f32.mrf.mxu2 }
 0x2cc   : > { %v1987_v35 = vpack.c.bf16 %v1146_v34, %v1144_v33 }
 0x2ce   : > { %2057 = vst [vmem:[#allocation3 + $0x20] sm:$0xff] %v1987_v35  }
 0x2d3   : > { %v1149_v37 = vpop.f32.mrf.mxu2 }
 0x2d5   : > { %v1875_v49 = vld [vmem:[#allocation3 + $0x20] sm:$0xff] }
 0x2db   : > { %v1151_v38 = vpop.f32.mrf.mxu2 }
 0x2dc   : > { %v1992_v39 = vpack.c.bf16 %v1151_v38, %v1149_v37 }
 0x2de   : > { %2058 = vst [vmem:[#allocation3 + $0x28] sm:$0xff] %v1992_v39  }
 0x2e3   : > { %v1154_v42 = vpop.f32.mrf.mxu2 }
 0x2e5   : > { %v1876_v47 = vld [vmem:[#allocation3 + $0x28] sm:$0xff] }
 0x2eb   : > { %v1156_v43 = vpop.f32.mrf.mxu2 }
 0x2ec   : > { %v1997_v44 = vpack.c.bf16 %v1156_v43, %v1154_v42 }
 0x2ee   : > { %2059 = vst [vmem:[#allocation3 + $0x38] sm:$0xff] %v1997_v44  }
 0x2f5   : > { %v1877_v45 = vld [vmem:[#allocation3 + $0x38] sm:$0xff] }
 0x2f6   : > { %1287 = vmatpush.bf16.msra.mxu3 %v1877_v45 }
 0x2fa   : > { %1288 = vmatpush.bf16.msra.mxu3 %v1876_v47 }
 0x2fe   : > { %1289 = vmatpush.bf16.msra.mxu3 %v1875_v49 }
 0x302   : > { %1290 = vmatpush.bf16.msra.mxu3 %v1874_v50 }
 0x306   : > { %1291 = vmatpush.bf16.msra.mxu3 %v1873_v51 }
 0x30a   : > { %1292 = vmatpush.bf16.msra.mxu3 %v1872_v52 }
 0x30e   : > { %1293 = vmatpush.bf16.msra.mxu3 %v1871_v53 }
 0x312   : > { %1294 = vmatpush.bf16.msra.mxu3 %v1870_v56 }
 0x315   : > { %1295 = vmatmul.bf16.vlgmr.msra.gmra.mxu3 %v2424_v60 }
 0x325   : > { %1300 = vmatmul.bf16.gmra.mxu3 %v2430_v63 }
 0x335   : > { %1305 = vmatmul.bf16.gmra.mxu3 %v2436_v2 }
 0x345   : > { %1310 = vmatmul.bf16.gmra.mxu3 %v2441_v4 }
 0x355   : > { %1315 = vmatmul.bf16.gmra.mxu3 %v2445_v5 }
 0x365   : > { %1320 = vmatmul.bf16.gmra.mxu3 %v2449_v6 }
 0x375   : > { %1325 = vmatmul.bf16.gmra.mxu3 %v2453_v9 }
 0x385   : > { %1330 = vmatmul.bf16.gmra.mxu3 %v2457_v14 }
 0x398   : > { %v1296_v57 = vpop.f32.mrf.mxu3 }
 0x399   : > { %v1371_v60 = vadd.f32 %v2540_v58, %v1296_v57 }
 0x39b   : > { %v1387_v2 = vmul.f32 %v1371_v60, %v2460_v17 }
 0x39d   : > { %v1403_v6 = vmax.f32 %v1387_v2, 0.0 }
 0x3a0   : > { %v1298_v63 = vpop.f32.mrf.mxu3 }
 0x3a1   : > { %v1372_v4 = vadd.f32 %v2540_v58, %v1298_v63 }
 0x3a3   : > { %v1388_v5 = vmul.f32 %v1372_v4, %v2470_v24 }
 0x3a5   : > { %v1404_v9 = vmax.f32 %v1388_v5, 0.0 }
 0x3a7   : > { %v2002_v14 = vpack.c.bf16 %v1404_v9, %v1403_v6 }
 0x3a8   : > { %v1301_v59 = vpop.f32.mrf.mxu3 }
 0x3a9   : > { %2003 = vst [vmem:[%s2549_s16] sm:$0xff] %v2002_v14   ;;  %v1373_v0 = vadd.f32 %v2540_v58, %v1301_v59 }
 0x3ab   : > { %v1389_v17 = vmul.f32 %v1373_v0, %v2473_v29 }
 0x3ad   : > { %v1405_v24 = vmax.f32 %v1389_v17, 0.0 }
 0x3b0   : > { %v1303_v1 = vpop.f32.mrf.mxu3 }
 0x3b1   : > { %v1374_v3 = vadd.f32 %v2540_v58, %v1303_v1 }
 0x3b3   : > { %v1390_v7 = vmul.f32 %v1374_v3, %v2478_v36 }
 0x3b5   : > { %v1406_v8 = vmax.f32 %v1390_v7, 0.0 }
 0x3b7   : > { %v2007_v11 = vpack.c.bf16 %v1406_v8, %v1405_v24 }
 0x3b8   : > { %v1306_v12 = vpop.f32.mrf.mxu3 }
 0x3b9   : > { %2060 = vst [vmem:[%s2549_s16 + $0x8] sm:$0xff] %v2007_v11   ;;  %v1375_v13 = vadd.f32 %v2540_v58, %v1306_v12 }
 0x3bb   : > { %v1391_v18 = vmul.f32 %v1375_v13, %v2481_v41 }
 0x3bd   : > { %v1407_v19 = vmax.f32 %v1391_v18, 0.0 }
 0x3c0   : > { %v1308_v15 = vpop.f32.mrf.mxu3 }
 0x3c1   : > { %v1376_v20 = vadd.f32 %v2540_v58, %v1308_v15 }
 0x3c3   : > { %v1392_v29 = vmul.f32 %v1376_v20, %v2486_v48 }
 0x3c5   : > { %v1408_v21 = vmax.f32 %v1392_v29, 0.0 }
 0x3c7   : > { %v2012_v22 = vpack.c.bf16 %v1408_v21, %v1407_v19 }
 0x3c8   : > { %v1311_v23 = vpop.f32.mrf.mxu3 }
 0x3c9   : > { %2061 = vst [vmem:[%s2549_s16 + $0x10] sm:$0xff] %v2012_v22   ;;  %v1377_v36 = vadd.f32 %v2540_v58, %v1311_v23 }
 0x3cb   : > { %v1393_v27 = vmul.f32 %v1377_v36, %v2490_v55 }
 0x3cd   : > { %v1409_v30 = vmax.f32 %v1393_v27, 0.0 }
 0x3d0   : > { %v1313_v25 = vpop.f32.mrf.mxu3 }
 0x3d1   : > { %v1378_v28 = vadd.f32 %v2540_v58, %v1313_v25 }
 0x3d3   : > { %v1394_v41 = vmul.f32 %v1378_v28, %v2494_v61 }
 0x3d5   : > { %v1410_v31 = vmax.f32 %v1394_v41, 0.0 }
 0x3d7   : > { %v2017_v33 = vpack.c.bf16 %v1410_v31, %v1409_v30 }
 0x3d8   : > { %v1316_v34 = vpop.f32.mrf.mxu3 }
 0x3d9   : > { %2062 = vst [vmem:[%s2549_s16 + $0x18] sm:$0xff] %v2017_v33   ;;  %v1379_v48 = vadd.f32 %v2540_v58, %v1316_v34 }
 0x3db   : > { %v1395_v37 = vmul.f32 %v1379_v48, %v2498_v10 }
 0x3dd   : > { %v1411_v39 = vmax.f32 %v1395_v37, 0.0 }
 0x3e0   : > { %v1318_v35 = vpop.f32.mrf.mxu3 }
 0x3e1   : > { %v1380_v38 = vadd.f32 %v2540_v58, %v1318_v35 }
 0x3e3   : > { %v1396_v55 = vmul.f32 %v1380_v38, %v2502_v16 }
 0x3e5   : > { %v1412_v42 = vmax.f32 %v1396_v55, 0.0 }
 0x3e7   : > { %v2022_v43 = vpack.c.bf16 %v1412_v42, %v1411_v39 }
 0x3e8   : > { %v1321_v44 = vpop.f32.mrf.mxu3 }
 0x3e9   : > { %2063 = vst [vmem:[%s2549_s16 + $0x20] sm:$0xff] %v2022_v43   ;;  %v1381_v61 = vadd.f32 %v2540_v58, %v1321_v44 }
 0x3eb   : > { %v1397_v47 = vmul.f32 %v1381_v61, %v2506_v26 }
 0x3ed   : > { %v1413_v50 = vmax.f32 %v1397_v47, 0.0 }
 0x3f0   : > { %v1323_v45 = vpop.f32.mrf.mxu3 }
 0x3f1   : > { %v1382_v49 = vadd.f32 %v2540_v58, %v1323_v45 }
 0x3f3   : > { %v1398_v10 = vmul.f32 %v1382_v49, %v2510_v32 }
 0x3f5   : > { %v1414_v51 = vmax.f32 %v1398_v10, 0.0 }
 0x3f7   : > { %v2027_v52 = vpack.c.bf16 %v1414_v51, %v1413_v50 }
 0x3f8   : > { %v1326_v16 = vpop.f32.mrf.mxu3 }
 0x3f9   : > { %2064 = vst [vmem:[%s2549_s16 + $0x28] sm:$0xff] %v2027_v52   ;;  %v1383_v53 = vadd.f32 %v2540_v58, %v1326_v16 }
 0x3fb   : > { %v1399_v57 = vmul.f32 %v1383_v53, %v2514_v40 }
 0x3fd   : > { %v1415_v63 = vmax.f32 %v1399_v57, 0.0 }
 0x400   : > { %v1328_v56 = vpop.f32.mrf.mxu3 }
 0x401   : > { %v1384_v60 = vadd.f32 %v2540_v58, %v1328_v56 }
 0x403   : > { %v1400_v26 = vmul.f32 %v1384_v60, %v2518_v46 }
 0x405   : > { %v1416_v2 = vmax.f32 %v1400_v26, 0.0 }
 0x407   : > { %v2032_v4 = vpack.c.bf16 %v1416_v2, %v1415_v63 }
 0x408   : > { %v1331_v32 = vpop.f32.mrf.mxu3 }
 0x409   : > { %2065 = vst [vmem:[%s2549_s16 + $0x30] sm:$0xff] %v2032_v4   ;;  %v1385_v5 = vadd.f32 %v2540_v58, %v1331_v32 }
 0x40b   : > { %v1401_v40 = vmul.f32 %v1385_v5, %v2522_v54 }
 0x40d   : > { %v1417_v14 = vmax.f32 %v1401_v40, 0.0 }
 0x410   : > { %v1333_v6 = vpop.f32.mrf.mxu3 }
 0x411   : > { %v1386_v46 = vadd.f32 %v2540_v58, %v1333_v6 }
 0x413   : > { %v1402_v9 = vmul.f32 %v1386_v46, %v2526_v62 }
 0x415   : > { %v1418_v59 = vmax.f32 %v1402_v9, 0.0 }
 0x417   : > { %v2037_v0 = vpack.c.bf16 %v1418_v59, %v1417_v14 }
 0x419   : > { %2066 = vst [vmem:[%s2549_s16 + $0x38] sm:$0xff] %v2037_v0  }
 0x41a   : > { %2224 = shalt.err (!%p2221_p8)
}
 0x41b   : > { %s2274_s14 = smov 64   ;;  %s2275_s16 = smov 4  }
 0x41c   : > { %2075 = dma.vmem_to_hbm [thread:$0]  (%p2354_p5), %s1465_s21, 1024, %s1467_s22, %s1452_s28, %s2274_s14, %s2274_s14, %s2275_s16  }
 0x41d PF: > { %p2092_p9 = scmp.ge.s32.totalorder %s2267_s27, 2  ;;  %s1481_s18 = sand.u32 1, %s2255_s24  }
 0x41e   : > { %s1482_s19 = scalar_lea.sflag [#allocation6], %s1481_s18 }
 0x41f   : > { %p2085_p10 = pnand %p2092_p9, %p2358_p6 }
 0x421   : > { %p2086_p11 = pneg %p2085_p10 }
 0x423   : > { %2250 = dma.done.wait (%p2086_p11), %s1482_s19, 1024  }
 0x424   : > { %2252 = vsyncadd (%p2086_p11), %s1482_s19, 4294966272  ;;  %p19_p12 = scmp.ge.s32.totalorder %s2341_s30, 4   ;;  %s2632_s24 = smov %s2259_s25 }
 0x425   : > { %s2633_s25 = smov %s2263_s26  ;;  %s2634_s26 = smov %s2352_s10 }
 0x426   : > { %s2635_s27 = smov %s2341_s30  ;;  %21 = sbr.rel (!%p19_p12) target bundleno = 5 (0x5), region = 98 }
 0x42b   :  { %1488 = vsyncpa [#allocation5], 1 }
 0x42c   :  { %1490 = vsyncpa [#allocation5 + $0x1], 1 }
 0x42d   :  { %1491 = vsyncpa [#allocation8], 1 }
 0x42e   :  { %1492 = vsyncpa [#allocation6], 1 }
 0x42f   :  { %1494 = vsyncpa [#allocation6 + $0x1], 1 }

</bundles_post_ra>
